<compile_context>
chip_gen: v7x
topology: tpu7x:2x2x1
jax: 0.10.0
libtpu: 0.0.40
codegen_flags: <defaults>
</compile_context>

<pallas_src>
import functools

import jax
import jax.numpy as jnp
from jax import lax
from jax.experimental import pallas as pl
from jax.experimental.pallas import tpu as pltpu


# ------------------------- fused Pallas kernel -------------------------

def _glo_kernel(code_ref, w1_ref, b1_ref, w2_ref, b2_ref, w3r_ref, b3r_ref,
                m1_ref, bias1_ref, gamma_ref, beta_ref, sel_ref, selt_ref,
                w2c_ref, bd2_ref, o_ref, hp_ref, x2p_ref, *, batch):
    B = batch
    f32 = jnp.float32
    bf16 = jnp.bfloat16

    # ---- MLP layers 1 & 2 (feature dims zero-padded to 128 lanes, f32) ----
    h = jnp.dot(code_ref[...], w1_ref[...], preferred_element_type=f32) + b1_ref[...]
    h = jnp.maximum(h, 0.0)
    h = jnp.dot(h, w2_ref[...], preferred_element_type=f32) + b2_ref[...]
    h2 = jnp.maximum(h, 0.0)                                   # (B, 128)

    # ---- MLP layer 3 emitted per original 5x5 row; 2x row upsample = dup store ----
    # hp rows: [0:4] zero pad | [4:14] the 10 upsampled rows | [14:18] zero pad
    hp_ref[0:4] = jnp.zeros((4, B, 80), bf16)
    hp_ref[14:18] = jnp.zeros((4, B, 80), bf16)
    for yh in range(5):
        row = jnp.dot(h2, w3r_ref[yh], preferred_element_type=f32) + b3r_ref[yh]
        row = jnp.maximum(row, 0.0).astype(bf16)               # (B, 80) lanes=(Xh*16+c)
        hp_ref[4 + 2 * yh] = row                               # upsampled row 2*yh
        hp_ref[5 + 2 * yh] = row                               # upsampled row 2*yh+1

    # ---- ConvTranspose2d(16,16,5): gather-form, 5 matmuls, value accumulator ----
    # rows of acc1 are ordered (y, b); lanes = xo*16 + out_ch, padded 224 -> 256.
    acc1 = None
    for ky in range(5):
        win = hp_ref[4 - ky:18 - ky].reshape(14 * B, 80)       # zero pads handle edges
        t = jnp.dot(win, m1_ref[ky], preferred_element_type=f32)
        acc1 = t if acc1 is None else acc1 + t                 # (14B, 256) f32

    # ---- conv bias + BatchNorm2d(16) (training-mode batch stats) + ReLU ----
    y1 = acc1 + bias1_ref[...]                                 # pad lanes stay 0
    n = float(B * 14 * 14)
    rs = jnp.sum(y1, axis=0, keepdims=True)                    # (1, 256)
    rs2 = jnp.sum(y1 * y1, axis=0, keepdims=True)              # (1, 256)
    mean = jnp.dot(rs, sel_ref[...], preferred_element_type=f32) / n    # (1, 16)
    ex2 = jnp.dot(rs2, sel_ref[...], preferred_element_type=f32) / n
    var = ex2 - mean * mean
    inv = lax.rsqrt(var + 1e-5)
    scale16 = inv * gamma_ref[...]
    shift16 = beta_ref[...] - mean * scale16
    scale = jnp.dot(scale16, selt_ref[...], preferred_element_type=f32)  # (1, 256)
    shift = jnp.dot(shift16, selt_ref[...], preferred_element_type=f32)
    x2 = jnp.maximum(y1 * scale + shift, 0.0)                  # (14B, 256), pads = 0

    # ---- stash x2 with one zero row above/below for the deconv2 row windows ----
    x2p_ref[0] = jnp.zeros((B, 256), bf16)
    x2p_ref[15] = jnp.zeros((B, 256), bf16)
    x2p_ref[1:15] = x2.astype(bf16).reshape(14, B, 256)

    # ---- Upsample(2x) + ConvTranspose2d(16,1,5,p=2) folded into 3 matmuls ----
    # result lanes: [0:28] even output rows, [28:56] odd output rows, rest pad.
    acc2 = None
    for idx in range(3):                                       # idx = d + 1, d = m - j
        win = x2p_ref[2 - idx:16 - idx].reshape(14 * B, 256)
        t = jnp.dot(win, w2c_ref[idx], preferred_element_type=f32)
        acc2 = t if acc2 is None else acc2 + t                 # (14B, 128) f32

    o_ref[...] = jax.nn.sigmoid(acc2 + bd2_ref[...])           # lane-dense store


# ------------------------------ wrapper ------------------------------

def generator_forward(code, params):
    B = code.shape[0]
    vmem = pl.BlockSpec(memory_space=pltpu.MemorySpace.VMEM)
    args = (code, params["w1"], params["b1"], params["w2"], params["b2"],
            params["w3row"], params["b3row"], params["m1c"], params["bias1"],
            params["gamma"], params["beta"], params["sel"], params["selT"],
            params["w2c"], params["bd2"])
    out = pl.pallas_call(
        functools.partial(_glo_kernel, batch=B),
        out_shape=jax.ShapeDtypeStruct((14 * B, 128), jnp.float32),
        in_specs=[vmem] * len(args),
        out_specs=vmem,
        scratch_shapes=[pltpu.VMEM((18, B, 80), jnp.bfloat16),    # padded deconv1 input
                        pltpu.VMEM((16, B, 256), jnp.bfloat16)],  # padded deconv2 input
    )(*args)
    # rows are (half_row m, image b); lanes 0..27 = even output row, 28..55 = odd.
    img = out[:, :56].reshape(14, B, 2, 28)
    img = jnp.transpose(img, (1, 0, 2, 3)).reshape(B, 1, 28, 28)
    return img


# ---------------------- parameter construction ----------------------

def init_params(key, code_dim, out_channels=1):
    assert out_channels == 1
    ks = jax.random.split(key, 10)

    def rn(k, shape, scale=0.1):
        return (scale * jax.random.normal(k, shape)).astype(jnp.float32)

    raw = {
        "W1": rn(ks[0], (code_dim, 84)), "b1": rn(ks[1], (84,)),
        "W2": rn(ks[2], (84, 120)),      "b2": rn(ks[3], (120,)),
        "W3": rn(ks[4], (120, 400)),     "b3": rn(ks[5], (400,)),
        "wt1": rn(ks[6], (16, 16, 5, 5)),            # ConvTranspose2d(16,16,5).weight
        "bd1": rn(ks[7], (16,)),
        "gamma": jnp.ones((16,), jnp.float32),
        "beta": jnp.zeros((16,), jnp.float32),
        "wt2": rn(ks[8], (16, 1, 5, 5)),             # ConvTranspose2d(16,1,5,p=2).weight
        "bd2": rn(ks[9], (1,)),
    }

    p = {}
    # MLP weights, zero-padded to 128 lanes (exact: padded channels stay 0), f32.
    p["w1"] = jnp.zeros((code_dim, 128), jnp.float32).at[:, :84].set(raw["W1"])
    p["b1"] = jnp.zeros((1, 128), jnp.float32).at[0, :84].set(raw["b1"])
    p["w2"] = jnp.zeros((128, 128), jnp.float32).at[:84, :120].set(raw["W2"])
    p["b2"] = jnp.zeros((1, 128), jnp.float32).at[0, :120].set(raw["b2"])

    # Linear(120,400) re-laid out per original 5x5 row: lanes = Xh*16 + c,
    # source column of the 400-vector = c*25 + Yh*5 + Xh  (View(-1,16,5,5)).
    w3row = jnp.zeros((5, 128, 80), jnp.float32)
    b3row = jnp.zeros((5, 1, 80), jnp.float32)
    for Yh in range(5):
        for Xh in range(5):
            cols = jnp.arange(16) * 25 + Yh * 5 + Xh
            w3row = w3row.at[Yh, :120, Xh * 16:(Xh + 1) * 16].set(raw["W3"][:, cols])
            b3row = b3row.at[Yh, 0, Xh * 16:(Xh + 1) * 16].set(raw["b3"][cols])
    p["w3row"], p["b3row"] = w3row, b3row

    # deconv1 taps with the 2x COLUMN upsample folded in (rows duplicated in-kernel):
    # m1c[ky, Xh*16+c, xo*16+o] = sum_{v in {0,1}, kx=xo-(2Xh+v) in [0,4]} wt1[c,o,ky,kx]
    m1c = jnp.zeros((5, 80, 256), jnp.float32)          # output cols padded 224 -> 256
    for Xh in range(5):
        for v in range(2):
            for kx in range(5):
                xo = 2 * Xh + v + kx
                if xo < 14:
                    blk = jnp.transpose(raw["wt1"][:, :, :, kx], (2, 0, 1))  # (ky,c,o)
                    m1c = m1c.at[:, Xh * 16:(Xh + 1) * 16,
                                 xo * 16:(xo + 1) * 16].add(blk)
    p["m1c"] = m1c.astype(jnp.bfloat16)

    # deconv1 bias tiled over the 14 output columns (lanes xo*16+o), pad lanes = 0.
    p["bias1"] = jnp.zeros((1, 256), jnp.float32).at[0, :224].set(
        jnp.tile(raw["bd1"], 14))
    p["gamma"] = raw["gamma"].reshape(1, 16)
    p["beta"] = raw["beta"].reshape(1, 16)

    # 0/1 selector that folds the 14 x-positions per channel for the BN statistics
    # (and its transpose to expand per-channel scale/shift back to 224 lanes).
    sel = jnp.zeros((256, 16), jnp.float32)
    for xo in range(14):
        sel = sel.at[xo * 16:(xo + 1) * 16, :].set(jnp.eye(16, dtype=jnp.float32))
    p["sel"], p["selT"] = sel, sel.T

    # deconv2 base per-ky column matrices with 2x COLUMN upsample + padding=2 crop:
    # m2u[ky, x*16+c, xf] = sum_{u in {0,1}} wt2[c,0,ky, xf+2-(2x+u)]
    m2u = jnp.zeros((5, 224, 28), jnp.float32)
    for x in range(14):
        for u in range(2):
            for kx in range(5):
                xf = 2 * x + u + kx - 2
                if 0 <= xf < 28:
                    blk = jnp.transpose(raw["wt2"][:, 0, :, kx], (1, 0))     # (ky, c)
                    m2u = m2u.at[:, x * 16:(x + 1) * 16, xf].add(blk)

    # Fold the 2x ROW upsample into 3 parity-combined matrices (d = out_half - in_row):
    # even output rows use K_even[d], odd rows K_odd[d]; packed side by side in lanes.
    K_even = [m2u[0], m2u[1] + m2u[2], m2u[3] + m2u[4]]          # d = -1, 0, +1
    K_odd = [m2u[0] + m2u[1], m2u[2] + m2u[3], m2u[4]]
    w2c = jnp.zeros((3, 256, 128), jnp.float32)
    for idx in range(3):
        w2c = w2c.at[idx, :224, 0:28].set(K_even[idx])
        w2c = w2c.at[idx, :224, 28:56].set(K_odd[idx])
    p["w2c"] = w2c.astype(jnp.bfloat16)
    p["bd2"] = jnp.full((1, 128), raw["bd2"][0], jnp.float32)
    return p, raw


# -------------------- pure-JAX reference (for checking) --------------------

def reference_forward(code, raw):
    B = code.shape[0]
    h = jnp.maximum(code @ raw["W1"] + raw["b1"], 0.0)
    h = jnp.maximum(h @ raw["W2"] + raw["b2"], 0.0)
    h = jnp.maximum(h @ raw["W3"] + raw["b3"], 0.0)
    x = h.reshape(B, 16, 5, 5)
    x = jnp.repeat(jnp.repeat(x, 2, axis=2), 2, axis=3)                  # (B,16,10,10)
    w = jnp.transpose(raw["wt1"], (1, 0, 2, 3))[:, :, ::-1, ::-1]
    y = lax.conv_general_dilated(x, w, (1, 1), ((4, 4), (4, 4)),
                                 dimension_numbers=("NCHW", "OIHW", "NCHW"))
    y = y + raw["bd1"].reshape(1, 16, 1, 1)
    mean = jnp.mean(y, axis=(0, 2, 3), keepdims=True)
    var = jnp.mean((y - mean) ** 2, axis=(0, 2, 3), keepdims=True)
    y = (y - mean) * lax.rsqrt(var + 1e-5)
    y = y * raw["gamma"].reshape(1, 16, 1, 1) + raw["beta"].reshape(1, 16, 1, 1)
    y = jnp.maximum(y, 0.0)
    y = jnp.repeat(jnp.repeat(y, 2, axis=2), 2, axis=3)                  # (B,16,28,28)
    w2 = jnp.transpose(raw["wt2"], (1, 0, 2, 3))[:, :, ::-1, ::-1]
    z = lax.conv_general_dilated(y, w2, (1, 1), ((2, 2), (2, 2)),
                                 dimension_numbers=("NCHW", "OIHW", "NCHW"))
    z = z + raw["bd2"].reshape(1, 1, 1, 1)
    return jax.nn.sigmoid(z)                                             # (B,1,28,28)


if __name__ == "__main__":
    key = jax.random.PRNGKey(0)
    pkey, ckey = jax.random.split(key)
    code_dim, batch = 32, 8        # batch a multiple of 8 (full sublane tiles)
    params, raw = init_params(pkey, code_dim)
    code = jax.random.normal(ckey, (batch, code_dim), dtype=jnp.float32)

    out = jax.jit(generator_forward)(code, params)
    out = jax.block_until_ready(out)
    assert out.shape == (batch, 1, 28, 28), out.shape
    assert bool(jnp.all(jnp.isfinite(out)))

    ref = jax.jit(reference_forward)(code, raw)
    err = float(jnp.max(jnp.abs(out - ref)))
    # bf16 matmul operands on the deconv path set the accuracy floor (~1e-2..5e-2).
    assert err < 1e-1, f"max abs err vs reference: {err}"
    print("KERNEL_OK")
</pallas_src>

<mosaic_0001>
module attributes {stable_mosaic.version = 11 : i64} {
  func.func @_glo_kernel(%arg0: memref<8x32xf32, #tpu.memory_space<vmem>>, %arg1: memref<32x128xf32, #tpu.memory_space<vmem>>, %arg2: memref<1x128xf32, #tpu.memory_space<vmem>>, %arg3: memref<128x128xf32, #tpu.memory_space<vmem>>, %arg4: memref<1x128xf32, #tpu.memory_space<vmem>>, %arg5: memref<5x128x80xf32, #tpu.memory_space<vmem>>, %arg6: memref<5x1x80xf32, #tpu.memory_space<vmem>>, %arg7: memref<5x80x256xbf16, #tpu.memory_space<vmem>>, %arg8: memref<1x256xf32, #tpu.memory_space<vmem>>, %arg9: memref<1x16xf32, #tpu.memory_space<vmem>>, %arg10: memref<1x16xf32, #tpu.memory_space<vmem>>, %arg11: memref<256x16xf32, #tpu.memory_space<vmem>>, %arg12: memref<16x256xf32, #tpu.memory_space<vmem>>, %arg13: memref<3x256x128xbf16, #tpu.memory_space<vmem>>, %arg14: memref<1x128xf32, #tpu.memory_space<vmem>>, %arg15: memref<112x128xf32, #tpu.memory_space<vmem>>, %arg16: memref<18x8x80xbf16, #tpu.memory_space<vmem>>, %arg17: memref<16x8x256xbf16, #tpu.memory_space<vmem>>) attributes {dimension_semantics = [], scalar_prefetch = 0 : i64, scratch_operands = 2 : i64, tpu.core_type = #tpu.core_type<tc>} {
    %c0 = arith.constant 0 : index
    %c0_0 = arith.constant 0 : index
    %0 = vector.load %arg0[%c0, %c0_0] : memref<8x32xf32, #tpu.memory_space<vmem>>, vector<8x32xf32>
    %c0_1 = arith.constant 0 : index
    %c0_2 = arith.constant 0 : index
    %1 = vector.load %arg1[%c0_1, %c0_2] : memref<32x128xf32, #tpu.memory_space<vmem>>, vector<32x128xf32>
    %cst = arith.constant dense<0.000000e+00> : vector<8x128xf32>
    %2 = tpu.matmul %0, %1, %cst {dimension_numbers = #tpu.dot_dimension_numbers<[1], [0], [0], [1], [0, 0, 1, 1], [], []>} : vector<8x32xf32>, vector<32x128xf32>, vector<8x128xf32> -> vector<8x128xf32>
    %c0_3 = arith.constant 0 : index
    %c0_4 = arith.constant 0 : index
    %3 = vector.load %arg2[%c0_3, %c0_4] : memref<1x128xf32, #tpu.memory_space<vmem>>, vector<1x128xf32>
    %4 = vector.broadcast %3 : vector<1x128xf32> to vector<8x128xf32>
    %5 = arith.addf %2, %4 : vector<8x128xf32>
    %cst_5 = arith.constant 0.000000e+00 : f32
    %6 = vector.broadcast %cst_5 : f32 to vector<8x128xf32>
    %7 = arith.maximumf %5, %6 : vector<8x128xf32>
    %c0_6 = arith.constant 0 : index
    %c0_7 = arith.constant 0 : index
    %8 = vector.load %arg3[%c0_6, %c0_7] : memref<128x128xf32, #tpu.memory_space<vmem>>, vector<128x128xf32>
    %cst_8 = arith.constant dense<0.000000e+00> : vector<8x128xf32>
    %9 = tpu.matmul %7, %8, %cst_8 {dimension_numbers = #tpu.dot_dimension_numbers<[1], [0], [0], [1], [0, 0, 1, 1], [], []>} : vector<8x128xf32>, vector<128x128xf32>, vector<8x128xf32> -> vector<8x128xf32>
    %c0_9 = arith.constant 0 : index
    %c0_10 = arith.constant 0 : index
    %10 = vector.load %arg4[%c0_9, %c0_10] : memref<1x128xf32, #tpu.memory_space<vmem>>, vector<1x128xf32>
    %11 = vector.broadcast %10 : vector<1x128xf32> to vector<8x128xf32>
    %12 = arith.addf %9, %11 : vector<8x128xf32>
    %cst_11 = arith.constant 0.000000e+00 : f32
    %13 = vector.broadcast %cst_11 : f32 to vector<8x128xf32>
    %14 = arith.maximumf %12, %13 : vector<8x128xf32>
    %cst_12 = arith.constant 0.000000e+00 : bf16
    %15 = vector.broadcast %cst_12 : bf16 to vector<4x8x80xbf16>
    %c0_13 = arith.constant 0 : index
    %c0_14 = arith.constant 0 : index
    %c0_15 = arith.constant 0 : index
    %16 = vector.load %arg16[%c0_13, %c0_14, %c0_15] : memref<18x8x80xbf16, #tpu.memory_space<vmem>>, vector<4x8x80xbf16>
    tpu.vector_store %arg16[%c0_13, %c0_14, %c0_15], %15 {strides = array<i32>} : memref<18x8x80xbf16, #tpu.memory_space<vmem>>, vector<4x8x80xbf16>,
    %cst_16 = arith.constant 0.000000e+00 : bf16
    %17 = vector.broadcast %cst_16 : bf16 to vector<4x8x80xbf16>
    %c14 = arith.constant 14 : index
    %c0_17 = arith.constant 0 : index
    %c0_18 = arith.constant 0 : index
    %18 = vector.load %arg16[%c14, %c0_17, %c0_18] : memref<18x8x80xbf16, #tpu.memory_space<vmem>>, vector<4x8x80xbf16>
    tpu.vector_store %arg16[%c14, %c0_17, %c0_18], %17 {strides = array<i32>} : memref<18x8x80xbf16, #tpu.memory_space<vmem>>, vector<4x8x80xbf16>,
    %c0_19 = arith.constant 0 : index
    %c0_20 = arith.constant 0 : index
    %c0_21 = arith.constant 0 : index
    %19 = vector.load %arg5[%c0_19, %c0_20, %c0_21] : memref<5x128x80xf32, #tpu.memory_space<vmem>>, vector<1x128x80xf32>
    %20 = vector.shape_cast %19 : vector<1x128x80xf32> to vector<128x80xf32>
    %cst_22 = arith.constant dense<0.000000e+00> : vector<8x80xf32>
    %21 = tpu.matmul %14, %20, %cst_22 {dimension_numbers = #tpu.dot_dimension_numbers<[1], [0], [0], [1], [0, 0, 1, 1], [], []>} : vector<8x128xf32>, vector<128x80xf32>, vector<8x80xf32> -> vector<8x80xf32>
    %c0_23 = arith.constant 0 : index
    %c0_24 = arith.constant 0 : index
    %c0_25 = arith.constant 0 : index
    %22 = vector.load %arg6[%c0_23, %c0_24, %c0_25] : memref<5x1x80xf32, #tpu.memory_space<vmem>>, vector<1x1x80xf32>
    %23 = vector.shape_cast %22 : vector<1x1x80xf32> to vector<1x80xf32>
    %24 = vector.broadcast %23 : vector<1x80xf32> to vector<8x80xf32>
    %25 = arith.addf %21, %24 : vector<8x80xf32>
    %cst_26 = arith.constant 0.000000e+00 : f32
    %26 = vector.broadcast %cst_26 : f32 to vector<8x80xf32>
    %27 = arith.maximumf %25, %26 : vector<8x80xf32>
    %28 = arith.truncf %27 : vector<8x80xf32> to vector<8x80xbf16>
    %c4 = arith.constant 4 : index
    %c0_27 = arith.constant 0 : index
    %c0_28 = arith.constant 0 : index
    %29 = vector.load %arg16[%c4, %c0_27, %c0_28] : memref<18x8x80xbf16, #tpu.memory_space<vmem>>, vector<1x8x80xbf16>
    %30 = vector.shape_cast %29 : vector<1x8x80xbf16> to vector<8x80xbf16>
    %31 = vector.shape_cast %28 : vector<8x80xbf16> to vector<1x8x80xbf16>
    tpu.vector_store %arg16[%c4, %c0_27, %c0_28], %31 {strides = array<i32>} : memref<18x8x80xbf16, #tpu.memory_space<vmem>>, vector<1x8x80xbf16>,
    %c5 = arith.constant 5 : index
    %c0_29 = arith.constant 0 : index
    %c0_30 = arith.constant 0 : index
    %32 = vector.load %arg16[%c5, %c0_29, %c0_30] : memref<18x8x80xbf16, #tpu.memory_space<vmem>>, vector<1x8x80xbf16>
    %33 = vector.shape_cast %32 : vector<1x8x80xbf16> to vector<8x80xbf16>
    %34 = vector.shape_cast %28 : vector<8x80xbf16> to vector<1x8x80xbf16>
    tpu.vector_store %arg16[%c5, %c0_29, %c0_30], %34 {strides = array<i32>} : memref<18x8x80xbf16, #tpu.memory_space<vmem>>, vector<1x8x80xbf16>,
    %c1 = arith.constant 1 : index
    %c0_31 = arith.constant 0 : index
    %c0_32 = arith.constant 0 : index
    %35 = vector.load %arg5[%c1, %c0_31, %c0_32] : memref<5x128x80xf32, #tpu.memory_space<vmem>>, vector<1x128x80xf32>
    %36 = vector.shape_cast %35 : vector<1x128x80xf32> to vector<128x80xf32>
    %cst_33 = arith.constant dense<0.000000e+00> : vector<8x80xf32>
    %37 = tpu.matmul %14, %36, %cst_33 {dimension_numbers = #tpu.dot_dimension_numbers<[1], [0], [0], [1], [0, 0, 1, 1], [], []>} : vector<8x128xf32>, vector<128x80xf32>, vector<8x80xf32> -> vector<8x80xf32>
    %c1_34 = arith.constant 1 : index
    %c0_35 = arith.constant 0 : index
    %c0_36 = arith.constant 0 : index
    %38 = vector.load %arg6[%c1_34, %c0_35, %c0_36] : memref<5x1x80xf32, #tpu.memory_space<vmem>>, vector<1x1x80xf32>
    %39 = vector.shape_cast %38 : vector<1x1x80xf32> to vector<1x80xf32>
    %40 = vector.broadcast %39 : vector<1x80xf32> to vector<8x80xf32>
    %41 = arith.addf %37, %40 : vector<8x80xf32>
    %cst_37 = arith.constant 0.000000e+00 : f32
    %42 = vector.broadcast %cst_37 : f32 to vector<8x80xf32>
    %43 = arith.maximumf %41, %42 : vector<8x80xf32>
    %44 = arith.truncf %43 : vector<8x80xf32> to vector<8x80xbf16>
    %c6 = arith.constant 6 : index
    %c0_38 = arith.constant 0 : index
    %c0_39 = arith.constant 0 : index
    %45 = vector.load %arg16[%c6, %c0_38, %c0_39] : memref<18x8x80xbf16, #tpu.memory_space<vmem>>, vector<1x8x80xbf16>
    %46 = vector.shape_cast %45 : vector<1x8x80xbf16> to vector<8x80xbf16>
    %47 = vector.shape_cast %44 : vector<8x80xbf16> to vector<1x8x80xbf16>
    tpu.vector_store %arg16[%c6, %c0_38, %c0_39], %47 {strides = array<i32>} : memref<18x8x80xbf16, #tpu.memory_space<vmem>>, vector<1x8x80xbf16>,
    %c7 = arith.constant 7 : index
    %c0_40 = arith.constant 0 : index
    %c0_41 = arith.constant 0 : index
    %48 = vector.load %arg16[%c7, %c0_40, %c0_41] : memref<18x8x80xbf16, #tpu.memory_space<vmem>>, vector<1x8x80xbf16>
    %49 = vector.shape_cast %48 : vector<1x8x80xbf16> to vector<8x80xbf16>
    %50 = vector.shape_cast %44 : vector<8x80xbf16> to vector<1x8x80xbf16>
    tpu.vector_store %arg16[%c7, %c0_40, %c0_41], %50 {strides = array<i32>} : memref<18x8x80xbf16, #tpu.memory_space<vmem>>, vector<1x8x80xbf16>,
    %c2 = arith.constant 2 : index
    %c0_42 = arith.constant 0 : index
    %c0_43 = arith.constant 0 : index
    %51 = vector.load %arg5[%c2, %c0_42, %c0_43] : memref<5x128x80xf32, #tpu.memory_space<vmem>>, vector<1x128x80xf32>
    %52 = vector.shape_cast %51 : vector<1x128x80xf32> to vector<128x80xf32>
    %cst_44 = arith.constant dense<0.000000e+00> : vector<8x80xf32>
    %53 = tpu.matmul %14, %52, %cst_44 {dimension_numbers = #tpu.dot_dimension_numbers<[1], [0], [0], [1], [0, 0, 1, 1], [], []>} : vector<8x128xf32>, vector<128x80xf32>, vector<8x80xf32> -> vector<8x80xf32>
    %c2_45 = arith.constant 2 : index
    %c0_46 = arith.constant 0 : index
    %c0_47 = arith.constant 0 : index
    %54 = vector.load %arg6[%c2_45, %c0_46, %c0_47] : memref<5x1x80xf32, #tpu.memory_space<vmem>>, vector<1x1x80xf32>
    %55 = vector.shape_cast %54 : vector<1x1x80xf32> to vector<1x80xf32>
    %56 = vector.broadcast %55 : vector<1x80xf32> to vector<8x80xf32>
    %57 = arith.addf %53, %56 : vector<8x80xf32>
    %cst_48 = arith.constant 0.000000e+00 : f32
    %58 = vector.broadcast %cst_48 : f32 to vector<8x80xf32>
    %59 = arith.maximumf %57, %58 : vector<8x80xf32>
    %60 = arith.truncf %59 : vector<8x80xf32> to vector<8x80xbf16>
    %c8 = arith.constant 8 : index
    %c0_49 = arith.constant 0 : index
    %c0_50 = arith.constant 0 : index
    %61 = vector.load %arg16[%c8, %c0_49, %c0_50] : memref<18x8x80xbf16, #tpu.memory_space<vmem>>, vector<1x8x80xbf16>
    %62 = vector.shape_cast %61 : vector<1x8x80xbf16> to vector<8x80xbf16>
    %63 = vector.shape_cast %60 : vector<8x80xbf16> to vector<1x8x80xbf16>
    tpu.vector_store %arg16[%c8, %c0_49, %c0_50], %63 {strides = array<i32>} : memref<18x8x80xbf16, #tpu.memory_space<vmem>>, vector<1x8x80xbf16>,
    %c9 = arith.constant 9 : index
    %c0_51 = arith.constant 0 : index
    %c0_52 = arith.constant 0 : index
    %64 = vector.load %arg16[%c9, %c0_51, %c0_52] : memref<18x8x80xbf16, #tpu.memory_space<vmem>>, vector<1x8x80xbf16>
    %65 = vector.shape_cast %64 : vector<1x8x80xbf16> to vector<8x80xbf16>
    %66 = vector.shape_cast %60 : vector<8x80xbf16> to vector<1x8x80xbf16>
    tpu.vector_store %arg16[%c9, %c0_51, %c0_52], %66 {strides = array<i32>} : memref<18x8x80xbf16, #tpu.memory_space<vmem>>, vector<1x8x80xbf16>,
    %c3 = arith.constant 3 : index
    %c0_53 = arith.constant 0 : index
    %c0_54 = arith.constant 0 : index
    %67 = vector.load %arg5[%c3, %c0_53, %c0_54] : memref<5x128x80xf32, #tpu.memory_space<vmem>>, vector<1x128x80xf32>
    %68 = vector.shape_cast %67 : vector<1x128x80xf32> to vector<128x80xf32>
    %cst_55 = arith.constant dense<0.000000e+00> : vector<8x80xf32>
    %69 = tpu.matmul %14, %68, %cst_55 {dimension_numbers = #tpu.dot_dimension_numbers<[1], [0], [0], [1], [0, 0, 1, 1], [], []>} : vector<8x128xf32>, vector<128x80xf32>, vector<8x80xf32> -> vector<8x80xf32>
    %c3_56 = arith.constant 3 : index
    %c0_57 = arith.constant 0 : index
    %c0_58 = arith.constant 0 : index
    %70 = vector.load %arg6[%c3_56, %c0_57, %c0_58] : memref<5x1x80xf32, #tpu.memory_space<vmem>>, vector<1x1x80xf32>
    %71 = vector.shape_cast %70 : vector<1x1x80xf32> to vector<1x80xf32>
    %72 = vector.broadcast %71 : vector<1x80xf32> to vector<8x80xf32>
    %73 = arith.addf %69, %72 : vector<8x80xf32>
    %cst_59 = arith.constant 0.000000e+00 : f32
    %74 = vector.broadcast %cst_59 : f32 to vector<8x80xf32>
    %75 = arith.maximumf %73, %74 : vector<8x80xf32>
    %76 = arith.truncf %75 : vector<8x80xf32> to vector<8x80xbf16>
    %c10 = arith.constant 10 : index
    %c0_60 = arith.constant 0 : index
    %c0_61 = arith.constant 0 : index
    %77 = vector.load %arg16[%c10, %c0_60, %c0_61] : memref<18x8x80xbf16, #tpu.memory_space<vmem>>, vector<1x8x80xbf16>
    %78 = vector.shape_cast %77 : vector<1x8x80xbf16> to vector<8x80xbf16>
    %79 = vector.shape_cast %76 : vector<8x80xbf16> to vector<1x8x80xbf16>
    tpu.vector_store %arg16[%c10, %c0_60, %c0_61], %79 {strides = array<i32>} : memref<18x8x80xbf16, #tpu.memory_space<vmem>>, vector<1x8x80xbf16>,
    %c11 = arith.constant 11 : index
    %c0_62 = arith.constant 0 : index
    %c0_63 = arith.constant 0 : index
    %80 = vector.load %arg16[%c11, %c0_62, %c0_63] : memref<18x8x80xbf16, #tpu.memory_space<vmem>>, vector<1x8x80xbf16>
    %81 = vector.shape_cast %80 : vector<1x8x80xbf16> to vector<8x80xbf16>
    %82 = vector.shape_cast %76 : vector<8x80xbf16> to vector<1x8x80xbf16>
    tpu.vector_store %arg16[%c11, %c0_62, %c0_63], %82 {strides = array<i32>} : memref<18x8x80xbf16, #tpu.memory_space<vmem>>, vector<1x8x80xbf16>,
    %c4_64 = arith.constant 4 : index
    %c0_65 = arith.constant 0 : index
    %c0_66 = arith.constant 0 : index
    %83 = vector.load %arg5[%c4_64, %c0_65, %c0_66] : memref<5x128x80xf32, #tpu.memory_space<vmem>>, vector<1x128x80xf32>
    %84 = vector.shape_cast %83 : vector<1x128x80xf32> to vector<128x80xf32>
    %cst_67 = arith.constant dense<0.000000e+00> : vector<8x80xf32>
    %85 = tpu.matmul %14, %84, %cst_67 {dimension_numbers = #tpu.dot_dimension_numbers<[1], [0], [0], [1], [0, 0, 1, 1], [], []>} : vector<8x128xf32>, vector<128x80xf32>, vector<8x80xf32> -> vector<8x80xf32>
    %c4_68 = arith.constant 4 : index
    %c0_69 = arith.constant 0 : index
    %c0_70 = arith.constant 0 : index
    %86 = vector.load %arg6[%c4_68, %c0_69, %c0_70] : memref<5x1x80xf32, #tpu.memory_space<vmem>>, vector<1x1x80xf32>
    %87 = vector.shape_cast %86 : vector<1x1x80xf32> to vector<1x80xf32>
    %88 = vector.broadcast %87 : vector<1x80xf32> to vector<8x80xf32>
    %89 = arith.addf %85, %88 : vector<8x80xf32>
    %cst_71 = arith.constant 0.000000e+00 : f32
    %90 = vector.broadcast %cst_71 : f32 to vector<8x80xf32>
    %91 = arith.maximumf %89, %90 : vector<8x80xf32>
    %92 = arith.truncf %91 : vector<8x80xf32> to vector<8x80xbf16>
    %c12 = arith.constant 12 : index
    %c0_72 = arith.constant 0 : index
    %c0_73 = arith.constant 0 : index
    %93 = vector.load %arg16[%c12, %c0_72, %c0_73] : memref<18x8x80xbf16, #tpu.memory_space<vmem>>, vector<1x8x80xbf16>
    %94 = vector.shape_cast %93 : vector<1x8x80xbf16> to vector<8x80xbf16>
    %95 = vector.shape_cast %92 : vector<8x80xbf16> to vector<1x8x80xbf16>
    tpu.vector_store %arg16[%c12, %c0_72, %c0_73], %95 {strides = array<i32>} : memref<18x8x80xbf16, #tpu.memory_space<vmem>>, vector<1x8x80xbf16>,
    %c13 = arith.constant 13 : index
    %c0_74 = arith.constant 0 : index
    %c0_75 = arith.constant 0 : index
    %96 = vector.load %arg16[%c13, %c0_74, %c0_75] : memref<18x8x80xbf16, #tpu.memory_space<vmem>>, vector<1x8x80xbf16>
    %97 = vector.shape_cast %96 : vector<1x8x80xbf16> to vector<8x80xbf16>
    %98 = vector.shape_cast %92 : vector<8x80xbf16> to vector<1x8x80xbf16>
    tpu.vector_store %arg16[%c13, %c0_74, %c0_75], %98 {strides = array<i32>} : memref<18x8x80xbf16, #tpu.memory_space<vmem>>, vector<1x8x80xbf16>,
    %c4_76 = arith.constant 4 : index
    %c0_77 = arith.constant 0 : index
    %c0_78 = arith.constant 0 : index
    %99 = vector.load %arg16[%c4_76, %c0_77, %c0_78] : memref<18x8x80xbf16, #tpu.memory_space<vmem>>, vector<14x8x80xbf16>
    %100 = vector.shape_cast %99 : vector<14x8x80xbf16> to vector<112x80xbf16>
    %c0_79 = arith.constant 0 : index
    %c0_80 = arith.constant 0 : index
    %c0_81 = arith.constant 0 : index
    %101 = vector.load %arg7[%c0_79, %c0_80, %c0_81] : memref<5x80x256xbf16, #tpu.memory_space<vmem>>, vector<1x80x256xbf16>
    %102 = vector.shape_cast %101 : vector<1x80x256xbf16> to vector<80x256xbf16>
    %cst_82 = arith.constant dense<0.000000e+00> : vector<112x256xf32>
    %103 = tpu.matmul %100, %102, %cst_82 {dimension_numbers = #tpu.dot_dimension_numbers<[1], [0], [0], [1], [0, 0, 1, 1], [], []>} : vector<112x80xbf16>, vector<80x256xbf16>, vector<112x256xf32> -> vector<112x256xf32>
    %c3_83 = arith.constant 3 : index
    %c0_84 = arith.constant 0 : index
    %c0_85 = arith.constant 0 : index
    %104 = vector.load %arg16[%c3_83, %c0_84, %c0_85] : memref<18x8x80xbf16, #tpu.memory_space<vmem>>, vector<14x8x80xbf16>
    %105 = vector.shape_cast %104 : vector<14x8x80xbf16> to vector<112x80xbf16>
    %c1_86 = arith.constant 1 : index
    %c0_87 = arith.constant 0 : index
    %c0_88 = arith.constant 0 : index
    %106 = vector.load %arg7[%c1_86, %c0_87, %c0_88] : memref<5x80x256xbf16, #tpu.memory_space<vmem>>, vector<1x80x256xbf16>
    %107 = vector.shape_cast %106 : vector<1x80x256xbf16> to vector<80x256xbf16>
    %cst_89 = arith.constant dense<0.000000e+00> : vector<112x256xf32>
    %108 = tpu.matmul %105, %107, %cst_89 {dimension_numbers = #tpu.dot_dimension_numbers<[1], [0], [0], [1], [0, 0, 1, 1], [], []>} : vector<112x80xbf16>, vector<80x256xbf16>, vector<112x256xf32> -> vector<112x256xf32>
    %109 = arith.addf %103, %108 : vector<112x256xf32>
    %c2_90 = arith.constant 2 : index
    %c0_91 = arith.constant 0 : index
    %c0_92 = arith.constant 0 : index
    %110 = vector.load %arg16[%c2_90, %c0_91, %c0_92] : memref<18x8x80xbf16, #tpu.memory_space<vmem>>, vector<14x8x80xbf16>
    %111 = vector.shape_cast %110 : vector<14x8x80xbf16> to vector<112x80xbf16>
    %c2_93 = arith.constant 2 : index
    %c0_94 = arith.constant 0 : index
    %c0_95 = arith.constant 0 : index
    %112 = vector.load %arg7[%c2_93, %c0_94, %c0_95] : memref<5x80x256xbf16, #tpu.memory_space<vmem>>, vector<1x80x256xbf16>
    %113 = vector.shape_cast %112 : vector<1x80x256xbf16> to vector<80x256xbf16>
    %cst_96 = arith.constant dense<0.000000e+00> : vector<112x256xf32>
    %114 = tpu.matmul %111, %113, %cst_96 {dimension_numbers = #tpu.dot_dimension_numbers<[1], [0], [0], [1], [0, 0, 1, 1], [], []>} : vector<112x80xbf16>, vector<80x256xbf16>, vector<112x256xf32> -> vector<112x256xf32>
    %115 = arith.addf %109, %114 : vector<112x256xf32>
    %c1_97 = arith.constant 1 : index
    %c0_98 = arith.constant 0 : index
    %c0_99 = arith.constant 0 : index
    %116 = vector.load %arg16[%c1_97, %c0_98, %c0_99] : memref<18x8x80xbf16, #tpu.memory_space<vmem>>, vector<14x8x80xbf16>
    %117 = vector.shape_cast %116 : vector<14x8x80xbf16> to vector<112x80xbf16>
    %c3_100 = arith.constant 3 : index
    %c0_101 = arith.constant 0 : index
    %c0_102 = arith.constant 0 : index
    %118 = vector.load %arg7[%c3_100, %c0_101, %c0_102] : memref<5x80x256xbf16, #tpu.memory_space<vmem>>, vector<1x80x256xbf16>
    %119 = vector.shape_cast %118 : vector<1x80x256xbf16> to vector<80x256xbf16>
    %cst_103 = arith.constant dense<0.000000e+00> : vector<112x256xf32>
    %120 = tpu.matmul %117, %119, %cst_103 {dimension_numbers = #tpu.dot_dimension_numbers<[1], [0], [0], [1], [0, 0, 1, 1], [], []>} : vector<112x80xbf16>, vector<80x256xbf16>, vector<112x256xf32> -> vector<112x256xf32>
    %121 = arith.addf %115, %120 : vector<112x256xf32>
    %c0_104 = arith.constant 0 : index
    %c0_105 = arith.constant 0 : index
    %c0_106 = arith.constant 0 : index
    %122 = vector.load %arg16[%c0_104, %c0_105, %c0_106] : memref<18x8x80xbf16, #tpu.memory_space<vmem>>, vector<14x8x80xbf16>
    %123 = vector.shape_cast %122 : vector<14x8x80xbf16> to vector<112x80xbf16>
    %c4_107 = arith.constant 4 : index
    %c0_108 = arith.constant 0 : index
    %c0_109 = arith.constant 0 : index
    %124 = vector.load %arg7[%c4_107, %c0_108, %c0_109] : memref<5x80x256xbf16, #tpu.memory_space<vmem>>, vector<1x80x256xbf16>
    %125 = vector.shape_cast %124 : vector<1x80x256xbf16> to vector<80x256xbf16>
    %cst_110 = arith.constant dense<0.000000e+00> : vector<112x256xf32>
    %126 = tpu.matmul %123, %125, %cst_110 {dimension_numbers = #tpu.dot_dimension_numbers<[1], [0], [0], [1], [0, 0, 1, 1], [], []>} : vector<112x80xbf16>, vector<80x256xbf16>, vector<112x256xf32> -> vector<112x256xf32>
    %127 = arith.addf %121, %126 : vector<112x256xf32>
    %c0_111 = arith.constant 0 : index
    %c0_112 = arith.constant 0 : index
    %128 = vector.load %arg8[%c0_111, %c0_112] : memref<1x256xf32, #tpu.memory_space<vmem>>, vector<1x256xf32>
    %129 = vector.broadcast %128 : vector<1x256xf32> to vector<112x256xf32>
    %130 = arith.addf %127, %129 : vector<112x256xf32>
    %cst_113 = arith.constant dense<0.000000e+00> : vector<256xf32>
    %131 = vector.multi_reduction <add>, %130, %cst_113 [0] : vector<112x256xf32> to vector<256xf32>
    %132 = vector.shape_cast %131 : vector<256xf32> to vector<1x256xf32>
    %133 = arith.mulf %130, %130 : vector<112x256xf32>
    %cst_114 = arith.constant dense<0.000000e+00> : vector<256xf32>
    %134 = vector.multi_reduction <add>, %133, %cst_114 [0] : vector<112x256xf32> to vector<256xf32>
    %135 = vector.shape_cast %134 : vector<256xf32> to vector<1x256xf32>
    %c0_115 = arith.constant 0 : index
    %c0_116 = arith.constant 0 : index
    %136 = vector.load %arg11[%c0_115, %c0_116] : memref<256x16xf32, #tpu.memory_space<vmem>>, vector<256x16xf32>
    %cst_117 = arith.constant dense<0.000000e+00> : vector<1x16xf32>
    %137 = tpu.matmul %132, %136, %cst_117 {dimension_numbers = #tpu.dot_dimension_numbers<[1], [0], [0], [1], [0, 0, 1, 1], [], []>} : vector<1x256xf32>, vector<256x16xf32>, vector<1x16xf32> -> vector<1x16xf32>
    %cst_118 = arith.constant 1.568000e+03 : f32
    %138 = vector.broadcast %cst_118 : f32 to vector<1x16xf32>
    %139 = arith.divf %137, %138 : vector<1x16xf32>
    %c0_119 = arith.constant 0 : index
    %c0_120 = arith.constant 0 : index
    %140 = vector.load %arg11[%c0_119, %c0_120] : memref<256x16xf32, #tpu.memory_space<vmem>>, vector<256x16xf32>
    %cst_121 = arith.constant dense<0.000000e+00> : vector<1x16xf32>
    %141 = tpu.matmul %135, %140, %cst_121 {dimension_numbers = #tpu.dot_dimension_numbers<[1], [0], [0], [1], [0, 0, 1, 1], [], []>} : vector<1x256xf32>, vector<256x16xf32>, vector<1x16xf32> -> vector<1x16xf32>
    %cst_122 = arith.constant 1.568000e+03 : f32
    %142 = vector.broadcast %cst_122 : f32 to vector<1x16xf32>
    %143 = arith.divf %141, %142 : vector<1x16xf32>
    %144 = arith.mulf %139, %139 : vector<1x16xf32>
    %145 = arith.subf %143, %144 : vector<1x16xf32>
    %cst_123 = arith.constant 9.99999974E-6 : f32
    %146 = vector.broadcast %cst_123 : f32 to vector<1x16xf32>
    %147 = arith.addf %145, %146 : vector<1x16xf32>
    %148 = math.rsqrt %147 : vector<1x16xf32>
    %c0_124 = arith.constant 0 : index
    %c0_125 = arith.constant 0 : index
    %149 = vector.load %arg9[%c0_124, %c0_125] : memref<1x16xf32, #tpu.memory_space<vmem>>, vector<1x16xf32>
    %150 = arith.mulf %148, %149 : vector<1x16xf32>
    %c0_126 = arith.constant 0 : index
    %c0_127 = arith.constant 0 : index
    %151 = vector.load %arg10[%c0_126, %c0_127] : memref<1x16xf32, #tpu.memory_space<vmem>>, vector<1x16xf32>
    %152 = arith.mulf %139, %150 : vector<1x16xf32>
    %153 = arith.subf %151, %152 : vector<1x16xf32>
    %c0_128 = arith.constant 0 : index
    %c0_129 = arith.constant 0 : index
    %154 = vector.load %arg12[%c0_128, %c0_129] : memref<16x256xf32, #tpu.memory_space<vmem>>, vector<16x256xf32>
    %cst_130 = arith.constant dense<0.000000e+00> : vector<1x256xf32>
    %155 = tpu.matmul %150, %154, %cst_130 {dimension_numbers = #tpu.dot_dimension_numbers<[1], [0], [0], [1], [0, 0, 1, 1], [], []>} : vector<1x16xf32>, vector<16x256xf32>, vector<1x256xf32> -> vector<1x256xf32>
    %c0_131 = arith.constant 0 : index
    %c0_132 = arith.constant 0 : index
    %156 = vector.load %arg12[%c0_131, %c0_132] : memref<16x256xf32, #tpu.memory_space<vmem>>, vector<16x256xf32>
    %cst_133 = arith.constant dense<0.000000e+00> : vector<1x256xf32>
    %157 = tpu.matmul %153, %156, %cst_133 {dimension_numbers = #tpu.dot_dimension_numbers<[1], [0], [0], [1], [0, 0, 1, 1], [], []>} : vector<1x16xf32>, vector<16x256xf32>, vector<1x256xf32> -> vector<1x256xf32>
    %158 = vector.broadcast %155 : vector<1x256xf32> to vector<112x256xf32>
    %159 = arith.mulf %130, %158 : vector<112x256xf32>
    %160 = vector.broadcast %157 : vector<1x256xf32> to vector<112x256xf32>
    %161 = arith.addf %159, %160 : vector<112x256xf32>
    %cst_134 = arith.constant 0.000000e+00 : f32
    %162 = vector.broadcast %cst_134 : f32 to vector<112x256xf32>
    %163 = arith.maximumf %161, %162 : vector<112x256xf32>
    %cst_135 = arith.constant 0.000000e+00 : bf16
    %164 = vector.broadcast %cst_135 : bf16 to vector<8x256xbf16>
    %c0_136 = arith.constant 0 : index
    %c0_137 = arith.constant 0 : index
    %c0_138 = arith.constant 0 : index
    %165 = vector.load %arg17[%c0_136, %c0_137, %c0_138] : memref<16x8x256xbf16, #tpu.memory_space<vmem>>, vector<1x8x256xbf16>
    %166 = vector.shape_cast %165 : vector<1x8x256xbf16> to vector<8x256xbf16>
    %167 = vector.shape_cast %164 : vector<8x256xbf16> to vector<1x8x256xbf16>
    tpu.vector_store %arg17[%c0_136, %c0_137, %c0_138], %167 {strides = array<i32>} : memref<16x8x256xbf16, #tpu.memory_space<vmem>>, vector<1x8x256xbf16>,
    %cst_139 = arith.constant 0.000000e+00 : bf16
    %168 = vector.broadcast %cst_139 : bf16 to vector<8x256xbf16>
    %c15 = arith.constant 15 : index
    %c0_140 = arith.constant 0 : index
    %c0_141 = arith.constant 0 : index
    %169 = vector.load %arg17[%c15, %c0_140, %c0_141] : memref<16x8x256xbf16, #tpu.memory_space<vmem>>, vector<1x8x256xbf16>
    %170 = vector.shape_cast %169 : vector<1x8x256xbf16> to vector<8x256xbf16>
    %171 = vector.shape_cast %168 : vector<8x256xbf16> to vector<1x8x256xbf16>
    tpu.vector_store %arg17[%c15, %c0_140, %c0_141], %171 {strides = array<i32>} : memref<16x8x256xbf16, #tpu.memory_space<vmem>>, vector<1x8x256xbf16>,
    %172 = arith.truncf %163 : vector<112x256xf32> to vector<112x256xbf16>
    %173 = vector.shape_cast %172 : vector<112x256xbf16> to vector<14x8x256xbf16>
    %c1_142 = arith.constant 1 : index
    %c0_143 = arith.constant 0 : index
    %c0_144 = arith.constant 0 : index
    %174 = vector.load %arg17[%c1_142, %c0_143, %c0_144] : memref<16x8x256xbf16, #tpu.memory_space<vmem>>, vector<14x8x256xbf16>
    tpu.vector_store %arg17[%c1_142, %c0_143, %c0_144], %173 {strides = array<i32>} : memref<16x8x256xbf16, #tpu.memory_space<vmem>>, vector<14x8x256xbf16>,
    %c2_145 = arith.constant 2 : index
    %c0_146 = arith.constant 0 : index
    %c0_147 = arith.constant 0 : index
    %175 = vector.load %arg17[%c2_145, %c0_146, %c0_147] : memref<16x8x256xbf16, #tpu.memory_space<vmem>>, vector<14x8x256xbf16>
    %176 = vector.shape_cast %175 : vector<14x8x256xbf16> to vector<112x256xbf16>
    %c0_148 = arith.constant 0 : index
    %c0_149 = arith.constant 0 : index
    %c0_150 = arith.constant 0 : index
    %177 = vector.load %arg13[%c0_148, %c0_149, %c0_150] : memref<3x256x128xbf16, #tpu.memory_space<vmem>>, vector<1x256x128xbf16>
    %178 = vector.shape_cast %177 : vector<1x256x128xbf16> to vector<256x128xbf16>
    %cst_151 = arith.constant dense<0.000000e+00> : vector<112x128xf32>
    %179 = tpu.matmul %176, %178, %cst_151 {dimension_numbers = #tpu.dot_dimension_numbers<[1], [0], [0], [1], [0, 0, 1, 1], [], []>} : vector<112x256xbf16>, vector<256x128xbf16>, vector<112x128xf32> -> vector<112x128xf32>
    %c1_152 = arith.constant 1 : index
    %c0_153 = arith.constant 0 : index
    %c0_154 = arith.constant 0 : index
    %180 = vector.load %arg17[%c1_152, %c0_153, %c0_154] : memref<16x8x256xbf16, #tpu.memory_space<vmem>>, vector<14x8x256xbf16>
    %181 = vector.shape_cast %180 : vector<14x8x256xbf16> to vector<112x256xbf16>
    %c1_155 = arith.constant 1 : index
    %c0_156 = arith.constant 0 : index
    %c0_157 = arith.constant 0 : index
    %182 = vector.load %arg13[%c1_155, %c0_156, %c0_157] : memref<3x256x128xbf16, #tpu.memory_space<vmem>>, vector<1x256x128xbf16>
    %183 = vector.shape_cast %182 : vector<1x256x128xbf16> to vector<256x128xbf16>
    %cst_158 = arith.constant dense<0.000000e+00> : vector<112x128xf32>
    %184 = tpu.matmul %181, %183, %cst_158 {dimension_numbers = #tpu.dot_dimension_numbers<[1], [0], [0], [1], [0, 0, 1, 1], [], []>} : vector<112x256xbf16>, vector<256x128xbf16>, vector<112x128xf32> -> vector<112x128xf32>
    %185 = arith.addf %179, %184 : vector<112x128xf32>
    %c0_159 = arith.constant 0 : index
    %c0_160 = arith.constant 0 : index
    %c0_161 = arith.constant 0 : index
    %186 = vector.load %arg17[%c0_159, %c0_160, %c0_161] : memref<16x8x256xbf16, #tpu.memory_space<vmem>>, vector<14x8x256xbf16>
    %187 = vector.shape_cast %186 : vector<14x8x256xbf16> to vector<112x256xbf16>
    %c2_162 = arith.constant 2 : index
    %c0_163 = arith.constant 0 : index
    %c0_164 = arith.constant 0 : index
    %188 = vector.load %arg13[%c2_162, %c0_163, %c0_164] : memref<3x256x128xbf16, #tpu.memory_space<vmem>>, vector<1x256x128xbf16>
    %189 = vector.shape_cast %188 : vector<1x256x128xbf16> to vector<256x128xbf16>
    %cst_165 = arith.constant dense<0.000000e+00> : vector<112x128xf32>
    %190 = tpu.matmul %187, %189, %cst_165 {dimension_numbers = #tpu.dot_dimension_numbers<[1], [0], [0], [1], [0, 0, 1, 1], [], []>} : vector<112x256xbf16>, vector<256x128xbf16>, vector<112x128xf32> -> vector<112x128xf32>
    %191 = arith.addf %185, %190 : vector<112x128xf32>
    %c0_166 = arith.constant 0 : index
    %c0_167 = arith.constant 0 : index
    %192 = vector.load %arg14[%c0_166, %c0_167] : memref<1x128xf32, #tpu.memory_space<vmem>>, vector<1x128xf32>
    %193 = vector.broadcast %192 : vector<1x128xf32> to vector<112x128xf32>
    %194 = arith.addf %191, %193 : vector<112x128xf32>
    %195 = arith.negf %194 : vector<112x128xf32>
    %196 = math.exp %195 : vector<112x128xf32>
    %cst_168 = arith.constant 1.000000e+00 : f32
    %197 = vector.broadcast %cst_168 : f32 to vector<112x128xf32>
    %198 = arith.addf %197, %196 : vector<112x128xf32>
    %199 = arith.divf %197, %198 : vector<112x128xf32>
    %c0_169 = arith.constant 0 : index
    %c0_170 = arith.constant 0 : index
    %200 = vector.load %arg15[%c0_169, %c0_170] : memref<112x128xf32, #tpu.memory_space<vmem>>, vector<112x128xf32>
    tpu.vector_store %arg15[%c0_169, %c0_170], %199 {strides = array<i32>} : memref<112x128xf32, #tpu.memory_space<vmem>>, vector<112x128xf32>,
    return
  }
}

</mosaic_0001>

<bundles_post_ra>
// kernel: generator_forward.1
= control target key start
LH: loop header
LB: loop body
LE: loop exit
PB: predicated region body
PF: predicated region fallthrough
CT: control target
= control target key end

     0   :  { %v5315_v0 = vmov 0.0|0.0   ;;  %vm5316_vm0 = vmmov 0   ;;  %v6908_v4 = vmov 0.0   ;;  %vm63_vm1 = vcmask 261120   ;;  %s6890_s1 = inlined_call_operand.vmem [shape: f32[32,128], index: 1, kind: input, shape index: {}]   ;;  %s6891_s3 = inlined_call_operand.vmem [shape: f32[128,128], index: 3, kind: input, shape index: {}]   ;;  %s6892_s0 = inlined_call_operand.vmem [shape: f32[8,32], index: 0, kind: input, shape index: {}]   ;;  %s6893_s5 = inlined_call_operand.vmem [shape: f32[5,128,80], index: 5, kind: input, shape index: {}]   ;;  %s6894_s2 = inlined_call_operand.vmem [shape: f32[1,128], index: 2, kind: input, shape index: {}]   ;;  %s6895_s7 = inlined_call_operand.vmem [shape: bf16[5,80,256], index: 7, kind: input, shape index: {}]   ;;  %s6896_s4 = inlined_call_operand.vmem [shape: f32[1,128], index: 4, kind: input, shape index: {}]   ;;  %s6897_s6 = inlined_call_operand.vmem [shape: f32[5,1,80], index: 6, kind: input, shape index: {}]   ;;  %s6898_s11 = inlined_call_operand.vmem [shape: f32[256,16], index: 11, kind: input, shape index: {}]   ;;  %s6899_s8 = inlined_call_operand.vmem [shape: f32[1,256], index: 8, kind: input, shape index: {}]   ;;  %s6900_s12 = inlined_call_operand.vmem [shape: f32[16,256], index: 12, kind: input, shape index: {}]   ;;  %s6901_s13 = inlined_call_operand.vmem [shape: bf16[3,256,128], index: 13, kind: input, shape index: {}]   ;;  %s6902_s9 = inlined_call_operand.vmem [shape: f32[1,16], index: 9, kind: input, shape index: {}]   ;;  %s6903_s10 = inlined_call_operand.vmem [shape: f32[1,16], index: 10, kind: input, shape index: {}]   ;;  %s6904_s14 = inlined_call_operand.vmem [shape: f32[1,128], index: 14, kind: input, shape index: {}]   ;;  %s6905_s15 = inlined_call_operand.vmem [shape: f32[112,128], index: 15, kind: output, shape index: {}]  }
   0x1   :  { %4761 = vmatprep.subr.bf16.mxu0 %v5315_v0  ;;  %v52_v1 = vld [vmem:[%s6890_s1] sm:$0xff]  ;;  %v53_v2 = vld [vmem:[%s6890_s1 + $0x8] sm:$0xff]  ;;  %v54_v3 = vld [vmem:[%s6890_s1 + $0x10] sm:$0xff]  ;;  %4548 = vmatprep.mubr.msk.f32.mxu0 %vm5316_vm0, %v6908_v4  ;;  %vm232_vm2 = vcmask 650240   ;;  %vm880_vm3 = vcmask 654336   ;;  %vm2334_vm4 = vcmask 130048  }
   0x2   :  { %v4762_v5 = vpack.c.bf16 %v53_v2, %v52_v1  ;;  %v55_v6 = vld [vmem:[%s6890_s1 + $0x18] sm:$0xff]  ;;  %4767 = vmatprep.subr.bf16.mxu1 %v5315_v0  ;;  %v138_v7 = vld [vmem:[%s6891_s3] sm:$0xff]  ;;  %4583 = vmatprep.mubr.msk.f32.mxu1 %vm5316_vm0, %v6908_v4  ;;  %v139_v8 = vld [vmem:[%s6891_s3 + $0x8] sm:$0xff] }
   0x3   :  { %v140_v9 = vld [vmem:[%s6891_s3 + $0x10] sm:$0xff]  ;;  %v141_v10 = vld [vmem:[%s6891_s3 + $0x18] sm:$0xff]  ;;  %v4765_v11 = vpack.c.bf16 %v55_v6, %v54_v3  ;;  %v4768_v12 = vpack.c.bf16 %v139_v8, %v138_v7  ;;  %v142_v14 = vld [vmem:[%s6891_s3 + $0x20] sm:$0xff] }
   0x4   :  { %4763 = vmatpush3.bf16.msra.mxu0 %v4762_v5  ;;  %v4771_v13 = vpack.c.bf16 %v141_v10, %v140_v9  ;;  %v143_v15 = vld [vmem:[%s6891_s3 + $0x28] sm:$0xff]  ;;  %v51_v16 = vld [vmem:[%s6892_s0] sm:$0xff]  ;;  %v144_v18 = vld [vmem:[%s6891_s3 + $0x30] sm:$0xff] }
   0x5   :  { %4764 = vmatprep.subr.bf16.mxu0 %v5315_v0  ;;  %4769 = vmatpush3.bf16.msra.mxu1 %v4768_v12  ;;  %v4774_v17 = vpack.c.bf16 %v143_v15, %v142_v14  ;;  %v145_v19 = vld [vmem:[%s6891_s3 + $0x38] sm:$0xff]  ;;  %v146_v21 = vld [vmem:[%s6891_s3 + $0x40] sm:$0xff]  ;;  %v147_v22 = vld [vmem:[%s6891_s3 + $0x48] sm:$0xff] }
   0x6   :  { %4770 = vmatprep.subr.bf16.mxu1 %v5315_v0  ;;  %v4777_v20 = vpack.c.bf16 %v145_v19, %v144_v18  ;;  %v4780_v23 = vpack.c.bf16 %v147_v22, %v146_v21  ;;  %v148_v24 = vld [vmem:[%s6891_s3 + $0x50] sm:$0xff]  ;;  %v149_v25 = vld [vmem:[%s6891_s3 + $0x58] sm:$0xff]  ;;  %v150_v27 = vld [vmem:[%s6891_s3 + $0x60] sm:$0xff] }
   0x7   :  { %v4783_v26 = vpack.c.bf16 %v149_v25, %v148_v24  ;;  %v151_v28 = vld [vmem:[%s6891_s3 + $0x68] sm:$0xff]  ;;  %v152_v30 = vld [vmem:[%s6891_s3 + $0x70] sm:$0xff]  ;;  %v153_v31 = vld [vmem:[%s6891_s3 + $0x78] sm:$0xff] }
   0x8   :  { %4766 = vmatpush3.bf16.msra.mxu0 %v4765_v11  ;;  %v4786_v29 = vpack.c.bf16 %v151_v28, %v150_v27  ;;  %v4789_v32 = vpack.c.bf16 %v153_v31, %v152_v30  ;;  %v242_v33 = vld [vmem:[%s6893_s5] sm:$0xff]  ;;  %v243_v34 = vld [vmem:[%s6893_s5 + $0x8] sm:$0xff]  ;;  %v244_v36 = vld [vmem:[%s6893_s5 + $0x10] sm:$0xff] }
   0x9   :  { %4791 = vmatprep.subr.bf16.mxu0 %v5315_v0  ;;  %4772 = vmatpush3.bf16.msra.mxu1 %v4771_v13  ;;  %v4792_v35 = vpack.c.bf16 %v243_v34, %v242_v33  ;;  %v245_v37 = vld [vmem:[%s6893_s5 + $0x18] sm:$0xff]  ;;  %v246_v39 = vld [vmem:[%s6893_s5 + $0x20] sm:$0xff]  ;;  %v247_v40 = vld [vmem:[%s6893_s5 + $0x28] sm:$0xff] }
   0xa   :  { %4773 = vmatprep.subr.bf16.mxu1 %v5315_v0  ;;  %v4795_v38 = vpack.c.bf16 %v245_v37, %v244_v36  ;;  %v4798_v41 = vpack.c.bf16 %v247_v40, %v246_v39  ;;  %v248_v42 = vld [vmem:[%s6893_s5 + $0x30] sm:$0xff]  ;;  %v249_v43 = vld [vmem:[%s6893_s5 + $0x38] sm:$0xff]  ;;  %v250_v45 = vld [vmem:[%s6893_s5 + $0x40] sm:$0xff] }
   0xb   :  { %4549 = vmatmul.mubr.msk.f32.vlgmr.msra.gmra.mrb[0].mxu0 %vm63_vm1, %v51_v16  ;;  %v4801_v44 = vpack.c.bf16 %v249_v43, %v248_v42  ;;  %v251_v46 = vld [vmem:[%s6893_s5 + $0x48] sm:$0xff]  ;;  %v252_v48 = vld [vmem:[%s6893_s5 + $0x50] sm:$0xff]  ;;  %v253_v49 = vld [vmem:[%s6893_s5 + $0x58] sm:$0xff] }
   0xc   :  { %4618 = vmatprep.mubr.msk.f32.mxu0 %vm5316_vm0, %v6908_v4  ;;  %4793 = vmatpush3.bf16.msra.mxu0 %v4792_v35  ;;  %v4804_v47 = vpack.c.bf16 %v251_v46, %v250_v45  ;;  %v4807_v50 = vpack.c.bf16 %v253_v49, %v252_v48  ;;  %v254_v51 = vld [vmem:[%s6893_s5 + $0x60] sm:$0xff]  ;;  %v255_v52 = vld [vmem:[%s6893_s5 + $0x68] sm:$0xff]  ;;  %v3734_v62 = vld [vmem:[%s6893_s5 + $0x90] sm:$0xff] }
   0xd   :  { %4775 = vmatpush3.bf16.msra.mxu1 %v4774_v17  ;;  %4794 = vmatprep.subr.bf16.mxu0 %v5315_v0  ;;  %v4810_v53 = vpack.c.bf16 %v255_v52, %v254_v51  ;;  %v3728_v54 = vld [vmem:[%s6894_s2] ss:$0 sm:$0xff]  ;;  %v3733_v56 = vld [vmem:[%s6893_s5 + $0x88] sm:$0xff]  ;;  %v3735_v63 = vld [vmem:[%s6893_s5 + $0x98] sm:$0xff] }
   0xe   :  { %4776 = vmatprep.subr.bf16.mxu1 %v5315_v0  ;;  %v3732_v55 = vld [vmem:[%s6893_s5 + $0x80] sm:$0xff]  ;;  %v4819_v1 = vpack.c.bf16 %v3735_v63, %v3734_v62  ;;  %v3737_v3 = vld [vmem:[%s6893_s5 + $0xa8] sm:$0xff]  ;;  %v3738_v6 = vld [vmem:[%s6893_s5 + $0xb0] sm:$0xff] }
   0xf   :  { %v4816_v60 = vpack.c.bf16 %v3733_v56, %v3732_v55  ;;  %v3736_v2 = vld [vmem:[%s6893_s5 + $0xa0] sm:$0xff]  ;;  %v3739_v7 = vld [vmem:[%s6893_s5 + $0xb8] sm:$0xff]  ;;  %v3741_v10 = vld [vmem:[%s6893_s5 + $0xc8] sm:$0xff] }
  0x10   :  { %4796 = vmatpush3.bf16.msra.mxu0 %v4795_v38  ;;  %v4822_v5 = vpack.c.bf16 %v3737_v3, %v3736_v2  ;;  %v4825_v8 = vpack.c.bf16 %v3739_v7, %v3738_v6  ;;  %v3740_v9 = vld [vmem:[%s6893_s5 + $0xc0] sm:$0xff]  ;;  %v3742_v12 = vld [vmem:[%s6893_s5 + $0xd0] sm:$0xff]  ;;  %v3743_v13 = vld [vmem:[%s6893_s5 + $0xd8] sm:$0xff] }
  0x11   :  { %4778 = vmatpush3.bf16.msra.mxu1 %v4777_v20  ;;  %4797 = vmatprep.subr.bf16.mxu0 %v5315_v0  ;;  %v4828_v11 = vpack.c.bf16 %v3741_v10, %v3740_v9  ;;  %v4831_v14 = vpack.c.bf16 %v3743_v13, %v3742_v12  ;;  %v3744_v15 = vld [vmem:[%s6893_s5 + $0xe0] sm:$0xff]  ;;  %v3745_v16 = vld [vmem:[%s6893_s5 + $0xe8] sm:$0xff]  ;;  %v256_v18 = vld [vmem:[%s6893_s5 + $0x70] sm:$0xff] }
  0x12   :  { %4779 = vmatprep.subr.bf16.mxu1 %v5315_v0  ;;  %v4834_v17 = vpack.c.bf16 %v3745_v16, %v3744_v15  ;;  %v257_v19 = vld [vmem:[%s6893_s5 + $0x78] sm:$0xff]  ;;  %v3746_v20 = vld [vmem:[%s6893_s5 + $0xf0] sm:$0xff]  ;;  %v3730_v24 = vld [vmem:[%s6896_s4] ss:$0 sm:$0xff] }
  0x13   :  { %v4813_v21 = vpack.c.bf16 %v257_v19, %v256_v18  ;;  %v3747_v22 = vld [vmem:[%s6893_s5 + $0xf8] sm:$0xff]  ;;  %v3750_v25 = vld [vmem:[%s6893_s5 + $0x100] sm:$0xff]  ;;  %v3769_v28 = vld [vmem:[%s6893_s5 + $0x188] sm:$0xff] }
  0x14   :  { %4799 = vmatpush3.bf16.msra.mxu0 %v4798_v41  ;;  %v3768_v27 = vld [vmem:[%s6893_s5 + $0x180] sm:$0xff]  ;;  %v3752_v34 = vld [vmem:[%s6893_s5 + $0x110] sm:$0xff]  ;;  %v3753_v36 = vld [vmem:[%s6893_s5 + $0x118] sm:$0xff] }
  0x15   :  { %4781 = vmatpush3.bf16.msra.mxu1 %v4780_v23  ;;  %4800 = vmatprep.subr.bf16.mxu0 %v5315_v0  ;;  %v4837_v23 = vpack.c.bf16 %v3747_v22, %v3746_v20  ;;  %v4864_v33 = vpack.c.bf16 %v3769_v28, %v3768_v27  ;;  %v3770_v37 = vld [vmem:[%s6893_s5 + $0x190] sm:$0xff]  ;;  %v3771_v38 = vld [vmem:[%s6893_s5 + $0x198] sm:$0xff]  ;;  %v4843_v39 = vpack.c.bf16 %v3753_v36, %v3752_v34  ;;  %v3754_v41 = vld [vmem:[%s6893_s5 + $0x120] sm:$0xff] }
  0x16   :  { %4782 = vmatprep.subr.bf16.mxu1 %v5315_v0  ;;  %v4867_v40 = vpack.c.bf16 %v3771_v38, %v3770_v37  ;;  %v3755_v42 = vld [vmem:[%s6893_s5 + $0x128] sm:$0xff]  ;;  %v3772_v43 = vld [vmem:[%s6893_s5 + $0x1a0] sm:$0xff]  ;;  %v3757_v48 = vld [vmem:[%s6893_s5 + $0x138] sm:$0xff] }
  0x17   :  { %v4846_v45 = vpack.c.bf16 %v3755_v42, %v3754_v41  ;;  %v3774_v49 = vld [vmem:[%s6893_s5 + $0x1b0] sm:$0xff]  ;;  %v3776_v55 = vld [vmem:[%s6893_s5 + $0x1c0] sm:$0xff]  ;;  %v3777_v56 = vld [vmem:[%s6893_s5 + $0x1c8] sm:$0xff] }
  0x18   :  { %4802 = vmatpush3.bf16.msra.mxu0 %v4801_v44  ;;  %v3773_v44 = vld [vmem:[%s6893_s5 + $0x1a8] sm:$0xff]  ;;  %v3779_v62 = vld [vmem:[%s6893_s5 + $0x1d8] sm:$0xff]  ;;  %v3762_v2 = vld [vmem:[%s6893_s5 + $0x160] sm:$0xff] }
  0x19   :  { %4784 = vmatpush3.bf16.msra.mxu1 %v4783_v26  ;;  %4803 = vmatprep.subr.bf16.mxu0 %v5315_v0  ;;  %v3751_v26 = vld [vmem:[%s6893_s5 + $0x108] sm:$0xff]  ;;  %v4870_v46 = vpack.c.bf16 %v3773_v44, %v3772_v43  ;;  %v3764_v9 = vld [vmem:[%s6893_s5 + $0x170] sm:$0xff]  ;;  %v3765_v10 = vld [vmem:[%s6893_s5 + $0x178] sm:$0xff] }
  0x1a   :  { %4785 = vmatprep.subr.bf16.mxu1 %v5315_v0  ;;  %v3763_v3 = vld [vmem:[%s6893_s5 + $0x168] sm:$0xff]  ;;  %v3783_v12 = vld [vmem:[%s6893_s5 + $0x1f8] sm:$0xff]  ;;  %v4861_v13 = vpack.c.bf16 %v3765_v10, %v3764_v9  ;;  %v3786_v15 = vld [vmem:[%s6893_s5 + $0x200] sm:$0xff] }
  0x1b   :  { %v3781_v6 = vld [vmem:[%s6893_s5 + $0x1e8] sm:$0xff]  ;;  %v4858_v7 = vpack.c.bf16 %v3763_v3, %v3762_v2  ;;  %v3788_v19 = vld [vmem:[%s6893_s5 + $0x210] sm:$0xff]  ;;  %v3789_v20 = vld [vmem:[%s6893_s5 + $0x218] sm:$0xff] }
  0x1c   :  { %4805 = vmatpush3.bf16.msra.mxu0 %v4804_v47  ;;  %v3756_v47 = vld [vmem:[%s6893_s5 + $0x130] sm:$0xff]  ;;  %v3787_v16 = vld [vmem:[%s6893_s5 + $0x208] sm:$0xff]  ;;  %v4891_v22 = vpack.c.bf16 %v3789_v20, %v3788_v19  ;;  %v3793_v27 = vld [vmem:[%s6893_s5 + $0x238] sm:$0xff] }
  0x1d   :  { %4787 = vmatpush3.bf16.msra.mxu1 %v4786_v29  ;;  %4806 = vmatprep.subr.bf16.mxu0 %v5315_v0  ;;  %v4849_v51 = vpack.c.bf16 %v3757_v48, %v3756_v47  ;;  %v4888_v18 = vpack.c.bf16 %v3787_v16, %v3786_v15  ;;  %v3798_v36 = vld [vmem:[%s6893_s5 + $0x260] sm:$0xff]  ;;  %v3799_v37 = vld [vmem:[%s6893_s5 + $0x268] sm:$0xff]  ;;  %v5107_v44 = vld [vmem:[%s6895_s7 + $0x74] ss:$8 sps:$4 sm:$0xff]   ;;  %v6906_v47 = vmov 0  }
  0x1e   :  { %4788 = vmatprep.subr.bf16.mxu1 %v5315_v0  ;;  %v4906_v38 = vpack.c.bf16 %v3799_v37, %v3798_v36  ;;  %v5104_v42 = vld [vmem:[%s6895_s7 + $0x64] ss:$8 sps:$4 sm:$0xff]   ;;  %v5102_v43 = vld [vmem:[%s6895_s7 + $0x60] ss:$8 sps:$4 sm:$0xff]   ;;  %233 = vst.msk [vmem:[#allocation2] sm:$0xf] %vm232_vm2, %v6906_v47 }
  0x1f   :  { %234 = vst.msk [vmem:[#allocation2 + $0x4] sm:$0xf] %vm232_vm2, %v6906_v47  ;;  %235 = vst.msk [vmem:[#allocation2 + $0x8] sm:$0xf] %vm232_vm2, %v6906_v47  ;;  %v5111_v48 = vld [vmem:[%s6895_s7 + $0x90] ss:$8 sps:$4 sm:$0xff]  }
  0x20   :  { %4808 = vmatpush3.bf16.msra.mxu0 %v4807_v50  ;;  %v3775_v50 = vld [vmem:[%s6893_s5 + $0x1b8] sm:$0xff]  ;;  %236 = vst.msk [vmem:[#allocation2 + $0xc] sm:$0xf] %vm232_vm2, %v6906_v47  ;;  %238 = vst.msk [vmem:[#allocation2 + $0x38] sm:$0xf] %vm232_vm2, %v6906_v47 }
  0x21   :  { %4790 = vmatpush3.bf16.msra.mxu1 %v4789_v32  ;;  %4809 = vmatprep.subr.bf16.mxu0 %v5315_v0  ;;  %v4840_v32 = vpack.c.bf16 %v3751_v26, %v3750_v25  ;;  %v4873_v52 = vpack.c.bf16 %v3775_v50, %v3774_v49  ;;  %v3792_v26 = vld [vmem:[%s6893_s5 + $0x230] sm:$0xff]  ;;  %239 = vst.msk [vmem:[#allocation2 + $0x3c] sm:$0xf] %vm232_vm2, %v6906_v47  ;;  %240 = vst.msk [vmem:[#allocation2 + $0x40] sm:$0xf] %vm232_vm2, %v6906_v47 }
  0x22   :  { %4815 = vmatprep.subr.bf16.mxu1 %v5315_v0  ;;  %v4897_v28 = vpack.c.bf16 %v3793_v27, %v3792_v26  ;;  %241 = vst.msk [vmem:[#allocation2 + $0x44] sm:$0xf] %vm232_vm2, %v6906_v47  ;;  %v5118_v49 = vld [vmem:[%s6895_s7 + $0x4] ss:$8 sps:$4 sm:$0xff]   ;;  %v3731_v50 = vld [vmem:[%s6897_s6] ss:$0 sm:$0xff] }
  0x23   :  { %v5121_v2 = vld [vmem:[%s6895_s7 + $0x10] ss:$8 sps:$4 sm:$0xff]   ;;  %v5126_v3 = vld [vmem:[%s6895_s7 + $0x24] ss:$8 sps:$4 sm:$0xff]   ;;  %v5132_v10 = vld [vmem:[%s6895_s7 + $0x40] ss:$8 sps:$4 sm:$0xff]  }
  0x24   :  { %4811 = vmatpush3.bf16.msra.mxu0 %v4810_v53  ;;  %v3758_v53 = vld [vmem:[%s6893_s5 + $0x140] sm:$0xff] }
  0x25   :  { %4812 = vmatprep.subr.bf16.mxu0 %v5315_v0  ;;  %v5134_v9 = vld [vmem:[%s6895_s7 + $0x44] ss:$8 sps:$4 sm:$0xff]   ;;  %v5136_v36 = vld [vmem:[%s6895_s7 + $0xa0] ss:$8 sps:$4 sm:$0xff]  }
  0x26   :  { %v3803_v26 = vld [vmem:[%s6897_s6 + $0x4] ss:$0 sm:$0xff] }
  0x28   :  { %4814 = vmatpush3.bf16.msra.mxu0 %v4813_v21  ;;  %v5099_v21 = vld [vmem:[%s6895_s7 + $0x50] ss:$8 sps:$4 sm:$0xff]  }
  0x29   :  { %4839 = vmatprep.subr.bf16.mxu0 %v5315_v0 }
  0xde   :  { %v133_v57 = vpop.f32.mrb[0].mxu0 }
  0xdf   :  { %v134_v58 = vadd.f32 %v3728_v54, %v133_v57  ;;  %v4550_v59 = vpop.f32.mrb[1].mxu0  ;;  %v3759_v54 = vld [vmem:[%s6893_s5 + $0x148] sm:$0xff] }
  0xe0   :  { %v4852_v57 = vpack.c.bf16 %v3759_v54, %v3758_v53  ;;  %v3760_v59 = vld [vmem:[%s6893_s5 + $0x150] sm:$0xff] }
  0xe1   :  { %v137_v61 = vmax.f32 %v134_v58, 0.0  ;;  %v4876_v58 = vpack.c.bf16 %v3777_v56, %v3776_v55 }
  0xe3   :  { %4584 = vmatmul.mubr.f32.vlgmr.msra.gmra.mrb[0].mxu1 %v137_v61  ;;  %v3778_v61 = vld [vmem:[%s6893_s5 + $0x1d0] sm:$0xff] }
  0xe4   :  { %4817 = vmatpush3.bf16.msra.mxu1 %v4816_v60  ;;  %4653 = vmatprep.mubr.msk.f32.mxu1 %vm5316_vm0, %v6908_v4  ;;  %v3761_v60 = vld [vmem:[%s6893_s5 + $0x158] sm:$0xff] }
  0xe5   :  { %4818 = vmatprep.subr.bf16.mxu1 %v5315_v0  ;;  %v4855_v63 = vpack.c.bf16 %v3761_v60, %v3760_v59 }
  0xe8   :  { %4820 = vmatpush3.bf16.msra.mxu1 %v4819_v1  ;;  %v4879_v1 = vpack.c.bf16 %v3779_v62, %v3778_v61  ;;  %v5116_v62 = vld [vmem:[%s6895_s7] ss:$8 sps:$4 sm:$0xff]  }
  0xe9   :  { %4821 = vmatprep.subr.bf16.mxu1 %v5315_v0 }
  0xec   :  { %4823 = vmatpush3.bf16.msra.mxu1 %v4822_v5  ;;  %v3780_v5 = vld [vmem:[%s6893_s5 + $0x1e0] sm:$0xff] }
  0xed   :  { %4824 = vmatprep.subr.bf16.mxu1 %v5315_v0 }
  0xf0   :  { %4826 = vmatpush3.bf16.msra.mxu1 %v4825_v8  ;;  %v4882_v8 = vpack.c.bf16 %v3781_v6, %v3780_v5  ;;  %v5124_v5 = vld [vmem:[%s6895_s7 + $0x20] ss:$8 sps:$4 sm:$0xff]   ;;  %v5130_v6 = vld [vmem:[%s6895_s7 + $0x34] ss:$8 sps:$4 sm:$0xff]  }
  0xf1   :  { %4827 = vmatprep.subr.bf16.mxu1 %v5315_v0 }
  0xf4   :  { %4829 = vmatpush3.bf16.msra.mxu1 %v4828_v11  ;;  %v3782_v11 = vld [vmem:[%s6893_s5 + $0x1f0] sm:$0xff] }
  0xf5   :  { %4830 = vmatprep.subr.bf16.mxu1 %v5315_v0 }
  0xf8   :  { %4832 = vmatpush3.bf16.msra.mxu1 %v4831_v14  ;;  %v4885_v14 = vpack.c.bf16 %v3783_v12, %v3782_v11  ;;  %v3767_v11 = vld [vmem:[%s6897_s6 + $0x2] ss:$0 sm:$0xff]  ;;  %v3785_v12 = vld [vmem:[%s6897_s6 + $0x3] ss:$0 sm:$0xff] }
  0xf9   :  { %4833 = vmatprep.subr.bf16.mxu1 %v5315_v0 }
  0xfc   :  { %4835 = vmatpush3.bf16.msra.mxu1 %v4834_v17  ;;  %v5101_v17 = vld [vmem:[%s6895_s7 + $0x54] ss:$8 sps:$4 sm:$0xff]  }
  0xfd   :  { %4836 = vmatprep.subr.bf16.mxu1 %v5315_v0 }
 0x100   :  { %4838 = vmatpush3.bf16.msra.mxu1 %v4837_v23  ;;  %v3790_v23 = vld [vmem:[%s6893_s5 + $0x220] sm:$0xff] }
 0x101   :  { %4863 = vmatprep.subr.bf16.mxu1 %v5315_v0 }
 0x1b6   :  { %v227_v29 = vpop.f32.mrb[0].mxu1 }
 0x1b7   :  { %v228_v30 = vadd.f32 %v3730_v24, %v227_v29  ;;  %v4585_v31 = vpop.f32.mrb[1].mxu1  ;;  %v3791_v24 = vld [vmem:[%s6893_s5 + $0x228] sm:$0xff]  ;;  %v3794_v29 = vld [vmem:[%s6893_s5 + $0x240] sm:$0xff] }
 0x1b8   :  { %v4894_v25 = vpack.c.bf16 %v3791_v24, %v3790_v23 }
 0x1b9   :  { %v5615_v35 = vmax.f32 %v228_v30, 0.0  ;;  %v3795_v30 = vld [vmem:[%s6893_s5 + $0x248] sm:$0xff] }
 0x1ba   :  { %v4900_v31 = vpack.c.bf16 %v3795_v30, %v3794_v29 }
 0x1bb   :  { %4619 = vmatmul.mubr.f32.vlgmr.msra.gmra.mrb[2].mxu0 %v5615_v35  ;;  %4654 = vmatmul.mubr.f32.vlgmr.msra.gmra.mrb[2].mxu1 %v5615_v35 }
 0x1bc   :  { %4841 = vmatpush3.bf16.msra.mxu0 %v4840_v32  ;;  %4865 = vmatpush3.bf16.msra.mxu1 %v4864_v33  ;;  %v3796_v32 = vld [vmem:[%s6893_s5 + $0x250] sm:$0xff]  ;;  %v3797_v33 = vld [vmem:[%s6893_s5 + $0x258] sm:$0xff] }
 0x1bd   :  { %4842 = vmatprep.subr.bf16.mxu0 %v5315_v0  ;;  %4866 = vmatprep.subr.bf16.mxu1 %v5315_v0  ;;  %v4903_v34 = vpack.c.bf16 %v3797_v33, %v3796_v32 }
 0x1be   :  { %4688 = vmatprep.mubr.msk.f32.mxu0 %vm5316_vm0, %v6908_v4  ;;  %4723 = vmatprep.mubr.msk.f32.mxu1 %vm5316_vm0, %v6908_v4 }
 0x1c0   :  { %4844 = vmatpush3.bf16.msra.mxu0 %v4843_v39  ;;  %4868 = vmatpush3.bf16.msra.mxu1 %v4867_v40  ;;  %v3800_v39 = vld [vmem:[%s6893_s5 + $0x270] sm:$0xff]  ;;  %v3801_v40 = vld [vmem:[%s6893_s5 + $0x278] sm:$0xff] }
 0x1c1   :  { %4845 = vmatprep.subr.bf16.mxu0 %v5315_v0  ;;  %4869 = vmatprep.subr.bf16.mxu1 %v5315_v0  ;;  %v4909_v41 = vpack.c.bf16 %v3801_v40, %v3800_v39  ;;  %v5141_v39 = vld [vmem:[%s6895_s7 + $0xb0] ss:$8 sps:$4 sm:$0xff]   ;;  %v5147_v40 = vld [vmem:[%s6895_s7 + $0xc4] ss:$8 sps:$4 sm:$0xff]  }
 0x1c4   :  { %4847 = vmatpush3.bf16.msra.mxu0 %v4846_v45  ;;  %4871 = vmatpush3.bf16.msra.mxu1 %v4870_v46  ;;  %v5110_v45 = vld [vmem:[%s6895_s7 + $0x84] ss:$8 sps:$4 sm:$0xff]   ;;  %v5113_v46 = vld [vmem:[%s6895_s7 + $0x94] ss:$8 sps:$4 sm:$0xff]  }
 0x1c5   :  { %4848 = vmatprep.subr.bf16.mxu0 %v5315_v0  ;;  %4872 = vmatprep.subr.bf16.mxu1 %v5315_v0 }
 0x1c8   :  { %4850 = vmatpush3.bf16.msra.mxu0 %v4849_v51  ;;  %4874 = vmatpush3.bf16.msra.mxu1 %v4873_v52  ;;  %v3749_v51 = vld [vmem:[%s6897_s6 + $0x1] ss:$0 sm:$0xff] }
 0x1c9   :  { %4851 = vmatprep.subr.bf16.mxu0 %v5315_v0  ;;  %4875 = vmatprep.subr.bf16.mxu1 %v5315_v0 }
 0x1cc   :  { %4853 = vmatpush3.bf16.msra.mxu0 %v4852_v57  ;;  %4877 = vmatpush3.bf16.msra.mxu1 %v4876_v58 }
 0x1cd   :  { %4854 = vmatprep.subr.bf16.mxu0 %v5315_v0  ;;  %4878 = vmatprep.subr.bf16.mxu1 %v5315_v0 }
 0x1d0   :  { %4856 = vmatpush3.bf16.msra.mxu0 %v4855_v63  ;;  %4880 = vmatpush3.bf16.msra.mxu1 %v4879_v1  ;;  %v5123_v63 = vld [vmem:[%s6895_s7 + $0x14] ss:$8 sps:$4 sm:$0xff]  }
 0x1d1   :  { %4857 = vmatprep.subr.bf16.mxu0 %v5315_v0  ;;  %4881 = vmatprep.subr.bf16.mxu1 %v5315_v0 }
 0x1d4   :  { %4859 = vmatpush3.bf16.msra.mxu0 %v4858_v7  ;;  %4883 = vmatpush3.bf16.msra.mxu1 %v4882_v8  ;;  %v5128_v8 = vld [vmem:[%s6895_s7 + $0x30] ss:$8 sps:$4 sm:$0xff]  }
 0x1d5   :  { %4860 = vmatprep.subr.bf16.mxu0 %v5315_v0  ;;  %4884 = vmatprep.subr.bf16.mxu1 %v5315_v0 }
 0x1d8   :  { %4862 = vmatpush3.bf16.msra.mxu0 %v4861_v13  ;;  %4886 = vmatpush3.bf16.msra.mxu1 %v4885_v14  ;;  %v5138_v13 = vld [vmem:[%s6895_s7 + $0xa4] ss:$8 sps:$4 sm:$0xff]  }
 0x1d9   :  { %4887 = vmatprep.subr.bf16.mxu0 %v5315_v0  ;;  %902 = vmatprep.subr.bf16.mxu1 %v5101_v17 }
 0x1db   :  { %4689 = vmatmul.mubr.f32.vlgmr.msra.gmra.mrb[4].mxu0 %v5615_v35  ;;  %4724 = vmatmul.mubr.f32.vlgmr.msra.gmra.mrb[4].mxu1 %v5615_v35 }
 0x1dc   :  { %4889 = vmatpush3.bf16.msra.mxu0 %v4888_v18  ;;  %4758 = vmatprep.mubr.msk.f32.mxu0 %vm5316_vm0, %v6908_v4 }
 0x1dd   :  { %4890 = vmatprep.subr.bf16.mxu0 %v5315_v0  ;;  %903 = vmatpush1.bf16.msra.mxu1 %v5099_v21 }
 0x1de   :  { %904 = vmatprep.subr.bf16.mxu1 %v5104_v42  ;;  %934 = vmatprep.mubr.bf16.mxu1 %v6906_v47 }
 0x1e0   :  { %4892 = vmatpush3.bf16.msra.mxu0 %v4891_v22 }
 0x1e1   :  { %4893 = vmatprep.subr.bf16.mxu0 %v5315_v0  ;;  %905 = vmatpush1.bf16.msra.mxu1 %v5102_v43  ;;  %v5152_v43 = vld [vmem:[%s6895_s7 + $0xd4] ss:$8 sps:$4 sm:$0xff]  }
 0x1e2   :  { %906 = vmatprep.subr.bf16.mxu1 %v5107_v44  ;;  %v5150_v44 = vld [vmem:[%s6895_s7 + $0xd0] ss:$8 sps:$4 sm:$0xff]  }
 0x1e4   :  { %4895 = vmatpush3.bf16.msra.mxu0 %v4894_v25 }
 0x1e5   :  { %4896 = vmatprep.subr.bf16.mxu0 %v5315_v0 }
 0x1e8   :  { %4898 = vmatpush3.bf16.msra.mxu0 %v4897_v28 }
 0x1e9   :  { %4899 = vmatprep.subr.bf16.mxu0 %v5315_v0 }
 0x1ec   :  { %4901 = vmatpush3.bf16.msra.mxu0 %v4900_v31 }
 0x1ed   :  { %4902 = vmatprep.subr.bf16.mxu0 %v5315_v0 }
 0x1f0   :  { %4904 = vmatpush3.bf16.msra.mxu0 %v4903_v34  ;;  %v5135_v34 = vld [vmem:[#allocation2 + $0x3c] sm:$0xff]  }
 0x1f1   :  { %4905 = vmatprep.subr.bf16.mxu0 %v5315_v0 }
 0x1f4   :  { %4907 = vmatpush3.bf16.msra.mxu0 %v4906_v38  ;;  %v5143_v38 = vld [vmem:[%s6895_s7 + $0xb4] ss:$8 sps:$4 sm:$0xff]  }
 0x1f5   :  { %4908 = vmatprep.subr.bf16.mxu0 %v5315_v0  ;;  %v5105_v0 = vld [vmem:[%s6895_s7 + $0x70] ss:$8 sps:$4 sm:$0xff]  }
 0x1f6   :  { %907 = vmatpush1.bf16.msra.mxu1 %v5105_v0  ;;  %v5156_v0 = vld [vmem:[%s6895_s7 + $0xe4] ss:$8 sps:$4 sm:$0xff]  }
 0x1f7   :  { %908 = vmatprep.subr.bf16.mxu1 %v5110_v45 }
 0x1f8   :  { %4910 = vmatpush3.bf16.msra.mxu0 %v4909_v41  ;;  %v5145_v41 = vld [vmem:[%s6895_s7 + $0xc0] ss:$8 sps:$4 sm:$0xff]  }
 0x1fb   :  { %4759 = vmatmul.mubr.f32.vlgmr.msra.gmra.mrb[6].mxu0 %v5615_v35  ;;  %v5108_v35 = vld [vmem:[%s6895_s7 + $0x80] ss:$8 sps:$4 sm:$0xff]  }
 0x1fc   :  { %909 = vmatpush1.bf16.msra.mxu1 %v5108_v35  ;;  %v5154_v35 = vld [vmem:[%s6895_s7 + $0xe0] ss:$8 sps:$4 sm:$0xff]  }
 0x1fd   :  { %910 = vmatprep.subr.bf16.mxu1 %v5113_v46  ;;  %v5160_v46 = vld [vmem:[%s6895_s7 + $0xf4] ss:$8 sps:$4 sm:$0xff]  }
 0x200   :  { %911 = vmatpush1.bf16.msra.mxu1 %v5111_v48 }
 0x201   :  { %1111 = vmatprep.subr.bf16.mxu1 %v5118_v49 }
 0x28e   :  { %v331_v52 = vpop.f32.mrb[2].mxu0  ;;  %v432_v53 = vpop.f32.mrb[2].mxu1 }
 0x28f   :  { %v332_v54 = vadd.f32 %v3731_v50, %v331_v52  ;;  %v433_v55 = vadd.f32 %v3749_v51, %v432_v53  ;;  %v4620_v56 = vpop.f32.mrb[3].mxu0  ;;  %v4655_v57 = vpop.f32.mrb[3].mxu1  ;;  %v5153_v50 = vld [vmem:[#allocation2 + $0x38] sm:$0xff]   ;;  %v5157_v51 = vld [vmem:[#allocation2 + $0x40] sm:$0xff]   ;;  %v5161_v52 = vld [vmem:[#allocation2 + $0x8] sm:$0xff]  }
 0x290   :  { %v5158_v53 = vld [vmem:[%s6895_s7 + $0xf0] ss:$8 sps:$4 sm:$0xff]   ;;  %v5169_v56 = vld [vmem:[%s6895_s7 + $0x114] ss:$8 sps:$4 sm:$0xff]  }
 0x291   :  { %v335_v58 = vmax.f32 %v332_v54, 0.0  ;;  %v436_v59 = vmax.f32 %v433_v55, 0.0  ;;  %v5165_v54 = vld [vmem:[%s6895_s7 + $0x104] ss:$8 sps:$4 sm:$0xff]   ;;  %v5163_v55 = vld [vmem:[%s6895_s7 + $0x100] ss:$8 sps:$4 sm:$0xff]  }
 0x292   :  { %v5167_v57 = vld [vmem:[%s6895_s7 + $0x110] ss:$8 sps:$4 sm:$0xff]  }
 0x293   :  { %v336_v60 = vpack.c.bf16 %v335_v58, %v335_v58  ;;  %v437_v61 = vpack.c.bf16 %v436_v59, %v436_v59  ;;  %v5174_v59 = vld [vmem:[%s6895_s7 + $0x124] ss:$8 sps:$4 sm:$0xff]  }
 0x295   :  { %338 = vst.msk [vmem:[#allocation2 + $0x10] sm:$0xf] %vm232_vm2, %v336_v60  ;;  %340 = vst.msk [vmem:[#allocation2 + $0x14] sm:$0xf] %vm232_vm2, %v336_v60  ;;  %v5172_v60 = vld [vmem:[%s6895_s7 + $0x120] ss:$8 sps:$4 sm:$0xff]  }
 0x296   :  { %439 = vst.msk [vmem:[#allocation2 + $0x18] sm:$0xf] %vm232_vm2, %v437_v61  ;;  %441 = vst.msk [vmem:[#allocation2 + $0x1c] sm:$0xf] %vm232_vm2, %v437_v61  ;;  %v5178_v61 = vld [vmem:[%s6895_s7 + $0x134] ss:$8 sps:$4 sm:$0xff]  }
 0x29c   :  { %v5114_v1 = vld [vmem:[#allocation2 + $0xc] sm:$0xff]  }
 0x29d   :  { %3831 = vmatmul.mubr.msk.bf16.vlgmr.msra.gmra.mrb[8].mxu1 %vm880_vm3, %v5114_v1  ;;  %v5115_v7 = vld [vmem:[#allocation2 + $0x14] sm:$0xff]   ;;  %v5182_v1 = vld [vmem:[%s6895_s7 + $0x144] ss:$8 sps:$4 sm:$0xff]  }
 0x29e   :  { %944 = vmatprep.mubr.bf16.mxu1 %v6906_v47  ;;  %1112 = vmatpush1.bf16.msra.mxu1 %v5116_v62  ;;  %v5139_v37 = vld [vmem:[#allocation2 + $0x10] sm:$0xff]   ;;  %v5140_v42 = vld [vmem:[#allocation2 + $0x18] sm:$0xff]  }
 0x29f   :  { %1113 = vmatprep.subr.bf16.mxu1 %v5123_v63  ;;  %v5162_v58 = vld [vmem:[#allocation2 + $0x10] sm:$0xff]   ;;  %v5166_v63 = vld [vmem:[#allocation2 + $0x18] sm:$0xff]  }
 0x2a0   :  { %v5176_v62 = vld [vmem:[%s6895_s7 + $0x130] ss:$8 sps:$4 sm:$0xff]  }
 0x2a2   :  { %1114 = vmatpush1.bf16.msra.mxu1 %v5121_v2 }
 0x2a3   :  { %1115 = vmatprep.subr.bf16.mxu1 %v5126_v3 }
 0x2a5   :  { %3832 = vmatmul.mubr.msk.bf16.gmra.mrb[12].mxu1 %vm880_vm3, %v5115_v7  ;;  %v5183_v7 = vld [vmem:[#allocation2 + $0x4] sm:$0xff]  }
 0x2a6   :  { %954 = vmatprep.mubr.bf16.mxu1 %v6906_v47  ;;  %1116 = vmatpush1.bf16.msra.mxu1 %v5124_v5 }
 0x2a7   :  { %1117 = vmatprep.subr.bf16.mxu1 %v5130_v6  ;;  %v5179_v6 = vld [vmem:[#allocation2 + $0x38] sm:$0xff]  }
 0x2aa   :  { %1118 = vmatpush1.bf16.msra.mxu1 %v5128_v8  ;;  %v5180_v8 = vld [vmem:[%s6895_s7 + $0x140] ss:$8 sps:$4 sm:$0xff]  }
 0x2ab   :  { %1119 = vmatprep.subr.bf16.mxu1 %v5134_v9  ;;  %v5187_v9 = vld [vmem:[%s6895_s7 + $0x154] ss:$8 sps:$4 sm:$0xff]  }
 0x2ae   :  { %v533_v14 = vpop.f32.mrb[4].mxu0  ;;  %v634_v15 = vpop.f32.mrb[4].mxu1  ;;  %1120 = vmatpush1.bf16.msra.mxu1 %v5132_v10  ;;  %v5185_v10 = vld [vmem:[%s6895_s7 + $0x150] ss:$8 sps:$4 sm:$0xff]  }
 0x2af   :  { %v534_v16 = vadd.f32 %v3767_v11, %v533_v14  ;;  %v635_v17 = vadd.f32 %v3785_v12, %v634_v15  ;;  %v4690_v18 = vpop.f32.mrb[5].mxu0  ;;  %v4725_v19 = vpop.f32.mrb[5].mxu1  ;;  %1346 = vmatprep.subr.bf16.mxu1 %v5138_v13  ;;  %v5191_v11 = vld [vmem:[%s6895_s7 + $0x164] ss:$8 sps:$4 sm:$0xff]   ;;  %v5189_v12 = vld [vmem:[%s6895_s7 + $0x160] ss:$8 sps:$4 sm:$0xff]  }
 0x2b0   :  { %v5184_v13 = vld [vmem:[#allocation2 + $0xc] sm:$0xff]   ;;  %v5196_v14 = vld [vmem:[%s6895_s7 + $0x174] ss:$8 sps:$4 sm:$0xff]  }
 0x2b1   :  { %v537_v20 = vmax.f32 %v534_v16, 0.0  ;;  %v638_v21 = vmax.f32 %v635_v17, 0.0  ;;  %v5194_v15 = vld [vmem:[%s6895_s7 + $0x170] ss:$8 sps:$4 sm:$0xff]   ;;  %v5200_v16 = vld [vmem:[%s6895_s7 + $0x184] ss:$8 sps:$4 sm:$0xff]  }
 0x2b2   :  { %v5198_v17 = vld [vmem:[%s6895_s7 + $0x180] ss:$8 sps:$4 sm:$0xff]   ;;  %v5188_v18 = vld [vmem:[#allocation2 + $0x14] sm:$0xff]  }
 0x2b3   :  { %v538_v22 = vpack.c.bf16 %v537_v20, %v537_v20  ;;  %v639_v23 = vpack.c.bf16 %v638_v21, %v638_v21 }
 0x2b5   :  { %540 = vst.msk [vmem:[#allocation2 + $0x20] sm:$0xf] %vm232_vm2, %v538_v22  ;;  %542 = vst.msk [vmem:[#allocation2 + $0x24] sm:$0xf] %vm232_vm2, %v538_v22 }
 0x2b6   :  { %641 = vst.msk [vmem:[#allocation2 + $0x28] sm:$0xf] %vm232_vm2, %v639_v23  ;;  %643 = vst.msk [vmem:[#allocation2 + $0x2c] sm:$0xf] %vm232_vm2, %v639_v23  ;;  %v5202_v23 = vld [vmem:[#allocation2] sm:$0xff]  }
 0x2bc   :  { %v5119_v24 = vld [vmem:[#allocation2 + $0x1c] sm:$0xff]  }
 0x2bd   :  { %3833 = vmatmul.mubr.msk.bf16.gmra.mrb[16].mxu1 %vm880_vm3, %v5119_v24  ;;  %v5120_v25 = vld [vmem:[#allocation2 + $0x24] sm:$0xff]   ;;  %v5192_v19 = vld [vmem:[#allocation2 + $0x1c] sm:$0xff]  }
 0x2be   :  { %964 = vmatprep.mubr.bf16.mxu1 %v6906_v47  ;;  %v5144_v45 = vld [vmem:[#allocation2 + $0x20] sm:$0xff]   ;;  %v5148_v48 = vld [vmem:[#allocation2 + $0x28] sm:$0xff]  }
 0x2bf   :  { %v5170_v2 = vld [vmem:[#allocation2 + $0x20] sm:$0xff]   ;;  %v5171_v3 = vld [vmem:[#allocation2 + $0x28] sm:$0xff]  }
 0x2c0   :  { %v5193_v20 = vld [vmem:[#allocation2 + $0x24] sm:$0xff]  }
 0x2c1   :  { %v5203_v24 = vld [vmem:[#allocation2 + $0x8] sm:$0xff]  }
 0x2c5   :  { %3834 = vmatmul.mubr.msk.bf16.gmra.mrb[20].mxu1 %vm880_vm3, %v5120_v25  ;;  %v5204_v25 = vld [vmem:[#allocation2 + $0x10] sm:$0xff]  }
 0x2c6   :  { %974 = vmatprep.mubr.bf16.mxu1 %v6906_v47 }
 0x2ce   :  { %v735_v27 = vpop.f32.mrb[6].mxu0 }
 0x2cf   :  { %v736_v28 = vadd.f32 %v3803_v26, %v735_v27  ;;  %v4760_v29 = vpop.f32.mrb[7].mxu0  ;;  %v5205_v26 = vld [vmem:[#allocation2 + $0x18] sm:$0xff]   ;;  %v5206_v27 = vld [vmem:[#allocation2 + $0x20] sm:$0xff]  }
 0x2d1   :  { %v739_v30 = vmax.f32 %v736_v28, 0.0  ;;  %v5207_v28 = vld [vmem:[#allocation2 + $0x28] sm:$0xff]  }
 0x2d3   :  { %v740_v31 = vpack.c.bf16 %v739_v30, %v739_v30  ;;  %v2162_v30 = vld [vmem:[%s6898_s11 + $0x80] sm:$0xff] }
 0x2d5   :  { %742 = vst.msk [vmem:[#allocation2 + $0x30] sm:$0xf] %vm232_vm2, %v740_v31  ;;  %744 = vst.msk [vmem:[#allocation2 + $0x34] sm:$0xf] %vm232_vm2, %v740_v31  ;;  %v2163_v31 = vld [vmem:[%s6898_s11 + $0x88] sm:$0xff] }
 0x2dc   :  { %v5127_v32 = vld [vmem:[#allocation2 + $0x2c] sm:$0xff]   ;;  %v5131_v33 = vld [vmem:[#allocation2 + $0x34] sm:$0xff]  }
 0x2dd   :  { %3835 = vmatmul.mubr.msk.bf16.gmra.mrb[24].mxu1 %vm880_vm3, %v5127_v32  ;;  %v5149_v49 = vld [vmem:[#allocation2 + $0x30] sm:$0xff]   ;;  %v2146_v32 = vld [vmem:[%s6898_s11] sm:$0xff] }
 0x2de   :  { %984 = vmatprep.mubr.bf16.mxu1 %v6906_v47  ;;  %v5175_v5 = vld [vmem:[#allocation2 + $0x30] sm:$0xff]  }
 0x2df   :  { %v5197_v21 = vld [vmem:[#allocation2 + $0x2c] sm:$0xff]   ;;  %v5201_v22 = vld [vmem:[#allocation2 + $0x34] sm:$0xff]  }
 0x2e0   :  { %v5208_v29 = vld [vmem:[#allocation2 + $0x30] sm:$0xff]  }
 0x2e5   :  { %3836 = vmatmul.mubr.msk.bf16.gmra.mrb[28].mxu1 %vm880_vm3, %v5131_v33  ;;  %v4911_v33 = vpack.c.bf16 %v2163_v31, %v2162_v30 }
 0x2e6   :  { %994 = vmatprep.mubr.bf16.mxu1 %v6906_v47 }
 0x2e7   :  { %4912 = vmatprep.subr.bf16.mxu0 %v4911_v33 }
 0x2ed   :  { %3837 = vmatmul.mubr.msk.bf16.gmra.mrb[32].mxu1 %vm880_vm3, %v5135_v34  ;;  %v2147_v34 = vld [vmem:[%s6898_s11 + $0x8] sm:$0xff] }
 0x2ee   :  { %1143 = vmatprep.mubr.bf16.mxu1 %v6906_v47 }
 0x2f5   :  { %3855 = vmatmul.mubr.msk.bf16.vlgmr.msra.gmra.mrb[8].mxu1 %vm880_vm3, %v5139_v37  ;;  %v2164_v37 = vld [vmem:[%s6898_s11 + $0x90] sm:$0xff] }
 0x2f6   :  { %1347 = vmatpush1.bf16.msra.mxu1 %v5136_v36  ;;  %1153 = vmatprep.mubr.bf16.mxu1 %v6906_v47  ;;  %v6052_v36 = vpack.c.bf16 %v2147_v34, %v2146_v32 }
 0x2f7   :  { %1348 = vmatprep.subr.bf16.mxu1 %v5143_v38  ;;  %v2165_v38 = vld [vmem:[%s6898_s11 + $0x98] sm:$0xff] }
 0x2f8   :  { %4914 = vmatpush3.bf16.msra.mxu0 %v6052_v36 }
 0x2fa   :  { %1349 = vmatpush1.bf16.msra.mxu1 %v5141_v39  ;;  %v6061_v39 = vpack.c.bf16 %v2165_v38, %v2164_v37 }
 0x2fb   :  { %1350 = vmatprep.subr.bf16.mxu1 %v5147_v40  ;;  %v2148_v40 = vld [vmem:[%s6898_s11 + $0x10] sm:$0xff] }
 0x2fc   :  { %4916 = vmatprep.subr.bf16.mxu0 %v6061_v39 }
 0x2fd   :  { %3856 = vmatmul.mubr.msk.bf16.gmra.mrb[12].mxu1 %vm880_vm3, %v5140_v42 }
 0x2fe   :  { %1163 = vmatprep.mubr.bf16.mxu1 %v6906_v47  ;;  %1351 = vmatpush1.bf16.msra.mxu1 %v5145_v41  ;;  %v2149_v41 = vld [vmem:[%s6898_s11 + $0x18] sm:$0xff] }
 0x2ff   :  { %1352 = vmatprep.subr.bf16.mxu1 %v5152_v43  ;;  %v6069_v42 = vpack.c.bf16 %v2149_v41, %v2148_v40  ;;  %v2166_v43 = vld [vmem:[%s6898_s11 + $0xa0] sm:$0xff] }
 0x301   :  { %4918 = vmatpush3.bf16.msra.mxu0 %v6069_v42 }
 0x302   :  { %1353 = vmatpush1.bf16.msra.mxu1 %v5150_v44  ;;  %v2167_v44 = vld [vmem:[%s6898_s11 + $0xa8] sm:$0xff] }
 0x303   :  { %1354 = vmatprep.subr.bf16.mxu1 %v5156_v0  ;;  %v2150_v0 = vld [vmem:[%s6898_s11 + $0x20] sm:$0xff] }
 0x305   :  { %3857 = vmatmul.mubr.msk.bf16.gmra.mrb[16].mxu1 %vm880_vm3, %v5144_v45  ;;  %v2151_v45 = vld [vmem:[%s6898_s11 + $0x28] sm:$0xff] }
 0x306   :  { %1173 = vmatprep.mubr.bf16.mxu1 %v6906_v47  ;;  %1355 = vmatpush1.bf16.msra.mxu1 %v5154_v35  ;;  %v6082_v35 = vpack.c.bf16 %v2167_v44, %v2166_v43 }
 0x307   :  { %1609 = vmatprep.subr.bf16.mxu1 %v5160_v46  ;;  %v6087_v46 = vpack.c.bf16 %v2151_v45, %v2150_v0 }
 0x308   :  { %4920 = vmatprep.subr.bf16.mxu0 %v6082_v35 }
 0x309   :  { %4922 = vmatpush3.bf16.msra.mxu0 %v6087_v46 }
 0x30d   :  { %3858 = vmatmul.mubr.msk.bf16.gmra.mrb[20].mxu1 %vm880_vm3, %v5148_v48  ;;  %v2168_v48 = vld [vmem:[%s6898_s11 + $0xb0] sm:$0xff] }
 0x30e   :  { %1183 = vmatprep.mubr.bf16.mxu1 %v6906_v47 }
 0x315   :  { %3859 = vmatmul.mubr.msk.bf16.gmra.mrb[24].mxu1 %vm880_vm3, %v5149_v49  ;;  %v2169_v49 = vld [vmem:[%s6898_s11 + $0xb8] sm:$0xff] }
 0x316   :  { %1193 = vmatprep.mubr.bf16.mxu1 %v6906_v47 }
 0x31d   :  { %3860 = vmatmul.mubr.msk.bf16.gmra.mrb[28].mxu1 %vm880_vm3, %v5153_v50  ;;  %v6097_v50 = vpack.c.bf16 %v2169_v49, %v2168_v48 }
 0x31e   :  { %1203 = vmatprep.mubr.bf16.mxu1 %v6906_v47 }
 0x31f   :  { %4924 = vmatprep.subr.bf16.mxu0 %v6097_v50 }
 0x325   :  { %3861 = vmatmul.mubr.msk.bf16.gmra.mrb[32].mxu1 %vm880_vm3, %v5157_v51  ;;  %v2152_v51 = vld [vmem:[%s6898_s11 + $0x30] sm:$0xff] }
 0x326   :  { %1378 = vmatprep.mubr.bf16.mxu1 %v6906_v47 }
 0x32d   :  { %3889 = vmatmul.mubr.msk.bf16.vlgmr.msra.gmra.mrb[8].mxu1 %vm880_vm3, %v5161_v52  ;;  %v2153_v52 = vld [vmem:[%s6898_s11 + $0x38] sm:$0xff] }
 0x32e   :  { %1610 = vmatpush1.bf16.msra.mxu1 %v5158_v53  ;;  %1388 = vmatprep.mubr.bf16.mxu1 %v6906_v47  ;;  %v6105_v53 = vpack.c.bf16 %v2153_v52, %v2152_v51 }
 0x32f   :  { %1611 = vmatprep.subr.bf16.mxu1 %v5165_v54  ;;  %v2170_v54 = vld [vmem:[%s6898_s11 + $0xc0] sm:$0xff] }
 0x330   :  { %4926 = vmatpush3.bf16.msra.mxu0 %v6105_v53 }
 0x332   :  { %1612 = vmatpush1.bf16.msra.mxu1 %v5163_v55  ;;  %v2171_v55 = vld [vmem:[%s6898_s11 + $0xc8] sm:$0xff] }
 0x333   :  { %1613 = vmatprep.subr.bf16.mxu1 %v5169_v56  ;;  %v6115_v56 = vpack.c.bf16 %v2171_v55, %v2170_v54 }
 0x335   :  { %3890 = vmatmul.mubr.msk.bf16.gmra.mrb[12].mxu1 %vm880_vm3, %v5162_v58  ;;  %v2155_v58 = vld [vmem:[%s6898_s11 + $0x48] sm:$0xff]  ;;  %4928 = vmatprep.subr.bf16.mxu0 %v6115_v56 }
 0x336   :  { %1398 = vmatprep.mubr.bf16.mxu1 %v6906_v47  ;;  %1614 = vmatpush1.bf16.msra.mxu1 %v5167_v57  ;;  %v2154_v57 = vld [vmem:[%s6898_s11 + $0x40] sm:$0xff] }
 0x337   :  { %1615 = vmatprep.subr.bf16.mxu1 %v5174_v59  ;;  %v6123_v59 = vpack.c.bf16 %v2155_v58, %v2154_v57 }
 0x339   :  { %4930 = vmatpush3.bf16.msra.mxu0 %v6123_v59 }
 0x33a   :  { %1616 = vmatpush1.bf16.msra.mxu1 %v5172_v60  ;;  %v2172_v60 = vld [vmem:[%s6898_s11 + $0xd0] sm:$0xff] }
 0x33b   :  { %1617 = vmatprep.subr.bf16.mxu1 %v5178_v61  ;;  %v2173_v61 = vld [vmem:[%s6898_s11 + $0xd8] sm:$0xff] }
 0x33d   :  { %3891 = vmatmul.mubr.msk.bf16.gmra.mrb[16].mxu1 %vm880_vm3, %v5166_v63  ;;  %v6135_v63 = vpack.c.bf16 %v2173_v61, %v2172_v60 }
 0x33e   :  { %1408 = vmatprep.mubr.bf16.mxu1 %v6906_v47  ;;  %1618 = vmatpush1.bf16.msra.mxu1 %v5176_v62  ;;  %v2156_v62 = vld [vmem:[%s6898_s11 + $0x50] sm:$0xff] }
 0x33f   :  { %1871 = vmatprep.subr.bf16.mxu1 %v5182_v1  ;;  %v2157_v1 = vld [vmem:[%s6898_s11 + $0x58] sm:$0xff]  ;;  %4932 = vmatprep.subr.bf16.mxu0 %v6135_v63 }
 0x345   :  { %3892 = vmatmul.mubr.msk.bf16.gmra.mrb[20].mxu1 %vm880_vm3, %v5170_v2  ;;  %v2174_v2 = vld [vmem:[%s6898_s11 + $0xe0] sm:$0xff] }
 0x346   :  { %1418 = vmatprep.mubr.bf16.mxu1 %v6906_v47 }
 0x34d   :  { %3893 = vmatmul.mubr.msk.bf16.gmra.mrb[24].mxu1 %vm880_vm3, %v5171_v3  ;;  %v2175_v3 = vld [vmem:[%s6898_s11 + $0xe8] sm:$0xff] }
 0x34e   :  { %1428 = vmatprep.mubr.bf16.mxu1 %v6906_v47 }
 0x355   :  { %3894 = vmatmul.mubr.msk.bf16.gmra.mrb[28].mxu1 %vm880_vm3, %v5175_v5  ;;  %v6147_v5 = vpack.c.bf16 %v2157_v1, %v2156_v62 }
 0x356   :  { %1438 = vmatprep.mubr.bf16.mxu1 %v6906_v47 }
 0x357   :  { %4934 = vmatpush3.bf16.msra.mxu0 %v6147_v5 }
 0x35d   :  { %3895 = vmatmul.mubr.msk.bf16.gmra.mrb[32].mxu1 %vm880_vm3, %v5179_v6  ;;  %v6150_v6 = vpack.c.bf16 %v2175_v3, %v2174_v2 }
 0x35e   :  { %1641 = vmatprep.mubr.bf16.mxu1 %v6906_v47 }
 0x35f   :  { %4936 = vmatprep.subr.bf16.mxu0 %v6150_v6 }
 0x365   :  { %3923 = vmatmul.mubr.msk.bf16.vlgmr.msra.gmra.mrb[8].mxu1 %vm880_vm3, %v5183_v7  ;;  %v2158_v7 = vld [vmem:[%s6898_s11 + $0x60] sm:$0xff] }
 0x366   :  { %1872 = vmatpush1.bf16.msra.mxu1 %v5180_v8  ;;  %1651 = vmatprep.mubr.bf16.mxu1 %v6906_v47  ;;  %v2159_v8 = vld [vmem:[%s6898_s11 + $0x68] sm:$0xff] }
 0x367   :  { %1873 = vmatprep.subr.bf16.mxu1 %v5187_v9  ;;  %v2176_v9 = vld [vmem:[%s6898_s11 + $0xf0] sm:$0xff] }
 0x36a   :  { %1874 = vmatpush1.bf16.msra.mxu1 %v5185_v10  ;;  %v2177_v10 = vld [vmem:[%s6898_s11 + $0xf8] sm:$0xff] }
 0x36b   :  { %1875 = vmatprep.subr.bf16.mxu1 %v5191_v11  ;;  %v6165_v11 = vpack.c.bf16 %v2159_v8, %v2158_v7 }
 0x36d   :  { %3924 = vmatmul.mubr.msk.bf16.gmra.mrb[12].mxu1 %vm880_vm3, %v5184_v13  ;;  %v2160_v13 = vld [vmem:[%s6898_s11 + $0x70] sm:$0xff]  ;;  %4938 = vmatpush3.bf16.msra.mxu0 %v6165_v11 }
 0x36e   :  { %1661 = vmatprep.mubr.bf16.mxu1 %v6906_v47  ;;  %1876 = vmatpush1.bf16.msra.mxu1 %v5189_v12  ;;  %v6168_v12 = vpack.c.bf16 %v2177_v10, %v2176_v9 }
 0x36f   :  { %1877 = vmatprep.subr.bf16.mxu1 %v5196_v14  ;;  %v2161_v14 = vld [vmem:[%s6898_s11 + $0x78] sm:$0xff] }
 0x370   :  { %4940 = vmatprep.subr.bf16.mxu0 %v6168_v12 }
 0x372   :  { %1878 = vmatpush1.bf16.msra.mxu1 %v5194_v15  ;;  %v6177_v15 = vpack.c.bf16 %v2161_v14, %v2160_v13 }
 0x373   :  { %1879 = vmatprep.subr.bf16.mxu1 %v5200_v16 }
 0x374   :  { %4942 = vmatpush3.bf16.msra.mxu0 %v6177_v15 }
 0x375   :  { %3925 = vmatmul.mubr.msk.bf16.gmra.mrb[16].mxu1 %vm880_vm3, %v5188_v18  ;;  %4944 = vmatprep.subr.bf16.mxu0 %v4911_v33 }
 0x376   :  { %1671 = vmatprep.mubr.bf16.mxu1 %v6906_v47  ;;  %1880 = vmatpush1.bf16.msra.mxu1 %v5198_v17  ;;  %v2004_v17 = vlaneseq }
 0x37d   :  { %3926 = vmatmul.mubr.msk.bf16.gmra.mrb[20].mxu1 %vm880_vm3, %v5192_v19 }
 0x37e   :  { %1681 = vmatprep.mubr.bf16.mxu1 %v6906_v47 }
 0x385   :  { %3927 = vmatmul.mubr.msk.bf16.gmra.mrb[24].mxu1 %vm880_vm3, %v5193_v20 }
 0x386   :  { %1691 = vmatprep.mubr.bf16.mxu1 %v6906_v47 }
 0x38d   :  { %3928 = vmatmul.mubr.msk.bf16.gmra.mrb[28].mxu1 %vm880_vm3, %v5197_v21  ;;  %v2005_v21 = vshrl.u32 %v2004_v17, 7 }
 0x38e   :  { %1701 = vmatprep.mubr.bf16.mxu1 %v6906_v47 }
 0x395   :  { %3929 = vmatmul.mubr.msk.bf16.gmra.mrb[32].mxu1 %vm880_vm3, %v5201_v22  ;;  %v2010_v22 = vsub.s32 1, %v2005_v21 }
 0x396   :  { %1903 = vmatprep.mubr.bf16.mxu1 %v6906_v47 }
 0x39d   :  { %3957 = vmatmul.mubr.msk.bf16.vlgmr.msra.gmra.mrb[8].mxu1 %vm880_vm3, %v5202_v23 }
 0x39e   :  { %1913 = vmatprep.mubr.bf16.mxu1 %v6906_v47 }
 0x3a5   :  { %3958 = vmatmul.mubr.msk.bf16.gmra.mrb[12].mxu1 %vm880_vm3, %v5203_v24  ;;  %v2002_v24 = vld [vmem:[%s6899_s8] sm:$0x3] }
 0x3a6   :  { %1923 = vmatprep.mubr.bf16.mxu1 %v6906_v47 }
 0x3ad   :  { %3959 = vmatmul.mubr.msk.bf16.gmra.mrb[16].mxu1 %vm880_vm3, %v5204_v25  ;;  %v6184_v25 = vsub.s32 0, %v2005_v21 }
 0x3ae   :  { %1933 = vmatprep.mubr.bf16.mxu1 %v6906_v47 }
 0x3af   :  { %v6189_v30 = vrot.slane %v2002_v24, %v6184_v25 }
 0x3b5   :  { %3960 = vmatmul.mubr.msk.bf16.gmra.mrb[20].mxu1 %vm880_vm3, %v5205_v26 }
 0x3b6   :  { %1943 = vmatprep.mubr.bf16.mxu1 %v6906_v47 }
 0x3bd   :  { %3961 = vmatmul.mubr.msk.bf16.gmra.mrb[24].mxu1 %vm880_vm3, %v5206_v27 }
 0x3be   :  { %1953 = vmatprep.mubr.bf16.mxu1 %v6906_v47 }
 0x3c5   :  { %3962 = vmatmul.mubr.msk.bf16.gmra.mrb[28].mxu1 %vm880_vm3, %v5207_v28 }
 0x3c6   :  { %1963 = vmatprep.mubr.bf16.mxu1 %v6906_v47 }
 0x3cd   :  { %3963 = vmatmul.mubr.msk.bf16.gmra.mrb[32].mxu1 %vm880_vm3, %v5208_v29  ;;  %v6186_v29 = vrot.slane %v2002_v24, %v2010_v22 }
 0x470   :  { %v1905_v16 = vpop.f32.mrb[8].mxu1 }
 0x471   :  { %v1907_v18 = vpop.f32.mrb[9].mxu1  ;;  %v6204_v38 = vadd.f32 %v6189_v30, %v1905_v16 }
 0x472   :  { %v1909_v19 = vpop.f32.mrb[10].mxu1  ;;  %v6198_v33 = vadd.f32 %v6186_v29, %v1907_v18 }
 0x473   :  { %v1911_v20 = vpop.f32.mrb[11].mxu1  ;;  %v6195_v32 = vadd.f32 %v6189_v30, %v1909_v19 }
 0x474   :  { %v6192_v31 = vadd.f32 %v6186_v29, %v1911_v20  ;;  %v2081_v48 = vmul.f32 %v6198_v33, %v6198_v33 }
 0x475   :  { %v2042_v0 = vadd.f32 %v6195_v32, %v6204_v38 }
 0x476   :  { %v2083_v43 = vmul.f32 %v6192_v31, %v6192_v31  ;;  %v2061_v49 = vadd.f32 %v6192_v31, %v6198_v33 }
 0x478   :  { %v1915_v23 = vpop.f32.mrb[12].mxu1  ;;  %v2127_v57 = vadd.f32 %v2083_v43, %v2081_v48 }
 0x479   :  { %v1917_v26 = vpop.f32.mrb[13].mxu1  ;;  %v6207_v40 = vadd.f32 %v6189_v30, %v1915_v23 }
 0x47a   :  { %v1919_v27 = vpop.f32.mrb[14].mxu1  ;;  %v6201_v34 = vadd.f32 %v6186_v29, %v1917_v26 }
 0x47b   :  { %v1921_v28 = vpop.f32.mrb[15].mxu1  ;;  %v2043_v54 = vadd.f32 %v2042_v0, %v6207_v40  ;;  %v6224_v55 = vadd.f32 %v6189_v30, %v1919_v27 }
 0x47c   :  { %v2085_v51 = vmul.f32 %v6201_v34, %v6201_v34  ;;  %v6220_v52 = vadd.f32 %v6186_v29, %v1921_v28  ;;  %v2062_v58 = vadd.f32 %v2061_v49, %v6201_v34 }
 0x47d   :  { %v2044_v3 = vadd.f32 %v2043_v54, %v6224_v55 }
 0x47e   :  { %v2128_v62 = vadd.f32 %v2127_v57, %v2085_v51  ;;  %v2087_v1 = vmul.f32 %v6220_v52, %v6220_v52  ;;  %v2063_v8 = vadd.f32 %v2062_v58, %v6220_v52  ;;  %v2082_v51 = vmul.f32 %v6195_v32, %v6195_v32 }
 0x480   :  { %v1925_v37 = vpop.f32.mrb[16].mxu1  ;;  %v2129_v18 = vadd.f32 %v2128_v62, %v2087_v1  ;;  %v2080_v1 = vmul.f32 %v6204_v38, %v6204_v38 }
 0x481   :  { %v1927_v41 = vpop.f32.mrb[17].mxu1  ;;  %v6231_v61 = vadd.f32 %v6189_v30, %v1925_v37 }
 0x482   :  { %v1929_v44 = vpop.f32.mrb[18].mxu1  ;;  %v6228_v60 = vadd.f32 %v6186_v29, %v1927_v41 }
 0x483   :  { %v1931_v45 = vpop.f32.mrb[19].mxu1  ;;  %v2045_v14 = vadd.f32 %v2044_v3, %v6231_v61  ;;  %v6244_v16 = vadd.f32 %v6189_v30, %v1929_v44 }
 0x484   :  { %v2089_v9 = vmul.f32 %v6228_v60, %v6228_v60  ;;  %v6240_v10 = vadd.f32 %v6186_v29, %v1931_v45  ;;  %v2064_v19 = vadd.f32 %v2063_v8, %v6228_v60 }
 0x485   :  { %v2046_v24 = vadd.f32 %v2045_v14, %v6244_v16 }
 0x486   :  { %v2130_v22 = vadd.f32 %v2129_v18, %v2089_v9  ;;  %v2091_v23 = vmul.f32 %v6240_v10, %v6240_v10  ;;  %v2065_v26 = vadd.f32 %v2064_v19, %v6240_v10 }
 0x488   :  { %v1935_v2 = vpop.f32.mrb[20].mxu1  ;;  %v2131_v0 = vadd.f32 %v2130_v22, %v2091_v23 }
 0x489   :  { %v1937_v7 = vpop.f32.mrb[21].mxu1  ;;  %v6251_v21 = vadd.f32 %v6189_v30, %v1935_v2  ;;  %v2084_v2 = vmul.f32 %v6207_v40, %v6207_v40 }
 0x48a   :  { %v1939_v13 = vpop.f32.mrb[22].mxu1  ;;  %v6248_v20 = vadd.f32 %v6186_v29, %v1937_v7 }
 0x48b   :  { %v1941_v17 = vpop.f32.mrb[23].mxu1  ;;  %v2047_v41 = vadd.f32 %v2046_v24, %v6251_v21  ;;  %v6264_v43 = vadd.f32 %v6189_v30, %v1939_v13  ;;  %v2108_v13 = vadd.f32 %v2082_v51, %v2080_v1  ;;  %v2086_v24 = vmul.f32 %v6224_v55, %v6224_v55 }
 0x48c   :  { %v2093_v27 = vmul.f32 %v6248_v20, %v6248_v20  ;;  %v6260_v28 = vadd.f32 %v6186_v29, %v1941_v17  ;;  %v2066_v45 = vadd.f32 %v2065_v26, %v6248_v20 }
 0x48d   :  { %v2048_v3 = vadd.f32 %v2047_v41, %v6264_v43  ;;  %v2109_v23 = vadd.f32 %v2108_v13, %v2084_v2 }
 0x48e   :  { %v2132_v58 = vadd.f32 %v2131_v0, %v2093_v27  ;;  %v2095_v62 = vmul.f32 %v6260_v28, %v6260_v28  ;;  %v2067_v7 = vadd.f32 %v2066_v45, %v6260_v28  ;;  %v2088_v45 = vmul.f32 %v6231_v61, %v6231_v61 }
 0x48f   :  { %v2110_v1 = vadd.f32 %v2109_v23, %v2086_v24  ;;  %v2092_v23 = vmul.f32 %v6251_v21, %v6251_v21 }
 0x490   :  { %v1945_v37 = vpop.f32.mrb[24].mxu1  ;;  %v2133_v18 = vadd.f32 %v2132_v58, %v2095_v62 }
 0x491   :  { %v1947_v44 = vpop.f32.mrb[25].mxu1  ;;  %v6273_v54 = vadd.f32 %v6189_v30, %v1945_v37  ;;  %v2111_v13 = vadd.f32 %v2110_v1, %v2088_v45 }
 0x492   :  { %v6268_v48 = vadd.f32 %v6186_v29, %v1947_v44  ;;  %v1949_v49 = vpop.f32.mrb[26].mxu1 }
 0x493   :  { %6915 = vst [vmem:[#allocation4_spill] sm:$0xff] %v6273_v54  ;;  %v1951_v57 = vpop.f32.mrb[27].mxu1  ;;  %v2049_v14 = vadd.f32 %v2048_v3, %v6273_v54  ;;  %v6290_v17 = vadd.f32 %v6189_v30, %v1949_v49 }
 0x494   :  { %v2097_v8 = vmul.f32 %v6268_v48, %v6268_v48  ;;  %v6286_v9 = vadd.f32 %v6186_v29, %v1951_v57  ;;  %v2068_v19 = vadd.f32 %v2067_v7, %v6268_v48 }
 0x495   :  { %v2050_v49 = vadd.f32 %v2049_v14, %v6290_v17  ;;  %v2090_v14 = vmul.f32 %v6244_v16, %v6244_v16 }
 0x496   :  { %v2134_v37 = vadd.f32 %v2133_v18, %v2097_v8  ;;  %v2099_v41 = vmul.f32 %v6286_v9, %v6286_v9  ;;  %v2069_v57 = vadd.f32 %v2068_v19, %v6286_v9 }
 0x498   :  { %v1955_v22 = vpop.f32.mrb[28].mxu1  ;;  %v2135_v7 = vadd.f32 %v2134_v37, %v2099_v41 }
 0x499   :  { %v6296_v26 = vadd.f32 %v6189_v30, %v1955_v22  ;;  %v1957_v27 = vpop.f32.mrb[29].mxu1 }
 0x49a   :  { %v6301_v44 = vadd.f32 %v6186_v29, %v1957_v27  ;;  %v1959_v0 = vpop.f32.mrb[30].mxu1 }
 0x49b   :  { %v1961_v51 = vpop.f32.mrb[31].mxu1  ;;  %v2051_v2 = vadd.f32 %v2050_v49, %v6296_v26  ;;  %v6314_v3 = vadd.f32 %v6189_v30, %v1959_v0  ;;  %v2112_v49 = vadd.f32 %v2111_v13, %v2090_v14  ;;  %v2100_v4 = vmul.f32 %v6296_v26, %v6296_v26 }
 0x49c   :  { %6916 = vst [vmem:[#allocation5_spill] sm:$0xff] %v6301_v44  ;;  %v2101_v58 = vmul.f32 %v6301_v44, %v6301_v44  ;;  %v6310_v62 = vadd.f32 %v6186_v29, %v1961_v51  ;;  %v2070_v8 = vadd.f32 %v2069_v57, %v6301_v44 }
 0x49d   :  { %v2052_v24 = vadd.f32 %v2051_v2, %v6314_v3 }
 0x49e   :  { %6917 = vst [vmem:[#allocation6_spill] sm:$0xff] %v6310_v62  ;;  %v2136_v18 = vadd.f32 %v2135_v7, %v2101_v58  ;;  %v2103_v19 = vmul.f32 %v6310_v62, %v6310_v62  ;;  %v2071_v41 = vadd.f32 %v2070_v8, %v6310_v62  ;;  %v2113_v8 = vadd.f32 %v2112_v49, %v2092_v23 }
 0x4a0   :  { %v1965_v22 = vpop.f32.mrb[32].mxu1  ;;  %v2137_v1 = vadd.f32 %v2136_v18, %v2103_v19  ;;  %v2096_v19 = vmul.f32 %v6273_v54, %v6273_v54 }
 0x4a1   :  { %v6325_v27 = vadd.f32 %v6189_v30, %v1965_v22  ;;  %v1967_v37 = vpop.f32.mrb[33].mxu1 }
 0x4a2   :  { %v6329_v0 = vadd.f32 %v6186_v29, %v1967_v37  ;;  %v1969_v45 = vpop.f32.mrb[34].mxu1  ;;  %v2094_v37 = vmul.f32 %v6264_v43, %v6264_v43 }
 0x4a3   :  { %v2053_v51 = vadd.f32 %v2052_v24, %v6325_v27  ;;  %v6333_v57 = vadd.f32 %v6189_v30, %v1969_v45  ;;  %v1971_v58 = vpop.f32.mrb[35].mxu1 }
 0x4a4   :  { %6918 = vst [vmem:[#allocation7_spill] sm:$0xff] %v6329_v0  ;;  %v2072_v2 = vadd.f32 %v2071_v41, %v6329_v0  ;;  %v2105_v7 = vmul.f32 %v6329_v0, %v6329_v0  ;;  %v6339_v22 = vadd.f32 %v6186_v29, %v1971_v58  ;;  %v2114_v29 = vadd.f32 %v2113_v8, %v2094_v37 }
 0x4a5   :  { %v2054_v13 = vadd.f32 %v2053_v51, %v6333_v57  ;;  %v2098_v51 = vmul.f32 %v6290_v17, %v6290_v17 }
 0x4a6   :  { %6919 = vst [vmem:[#allocation8_spill] sm:$0xff] %v6339_v22  ;;  %v2138_v14 = vadd.f32 %v2137_v1, %v2105_v7  ;;  %v2073_v30 = vadd.f32 %v2072_v2, %v6339_v22  ;;  %v2107_v18 = vmul.f32 %v6339_v22, %v6339_v22  ;;  %v2115_v47 = vadd.f32 %v2114_v29, %v2096_v19 }
 0x4a7   :  { %v2055_v24 = vrot.slane %v2054_v13, 4  ;;  %v2104_v19 = vmul.f32 %v6325_v27, %v6325_v27 }
 0x4a8   :  { %v2074_v41 = vrot.slane %v2073_v30, 4  ;;  %v2139_v45 = vadd.f32 %v2138_v14, %v2107_v18  ;;  %v2116_v44 = vadd.f32 %v2115_v47, %v2098_v51 }
 0x4a9   :  { %v2056_v58 = vadd.f32 %v2055_v24, %v2054_v13  ;;  %v2102_v13 = vmul.f32 %v6314_v3, %v6314_v3 }
 0x4aa   :  { %v2075_v23 = vadd.f32 %v2074_v41, %v2073_v30  ;;  %v2140_v49 = vrot.slane %v2139_v45, 4  ;;  %v2117_v37 = vadd.f32 %v2116_v44, %v2100_v4  ;;  %v2106_v4 = vmul.f32 %v6333_v57, %v6333_v57 }
 0x4ab   :  { %v2057_v1 = vrot.slane %v2056_v58, 2 }
 0x4ac   :  { %v2076_v7 = vrot.slane %v2075_v23, 2  ;;  %v2141_v2 = vadd.f32 %v2140_v49, %v2139_v45  ;;  %v2118_v45 = vadd.f32 %v2117_v37, %v2102_v13  ;;  %v5210_v13 = vld [vmem:[%s6901_s13 + $0x80] sm:$0xff]  }
 0x4ad   :  { %v2058_v22 = vadd.f32 %v2057_v1, %v2056_v58  ;;  %v2325_v1 = vld [vmem:[%s6902_s9] sm:$0x1] }
 0x4ae   :  { %v2077_v0 = vadd.f32 %v2076_v7, %v2075_v23  ;;  %v2142_v62 = vrot.slane %v2141_v2, 2  ;;  %v2119_v47 = vadd.f32 %v2118_v45, %v2104_v19  ;;  %v5212_v19 = vld [vmem:[%s6901_s13 + $0x88] sm:$0xff]   ;;  %v5215_v45 = vld [vmem:[%s6901_s13 + $0xd8] sm:$0xff]  }
 0x4af   :  { %v2059_v54 = vrot.slane %v2058_v22, 1 }
 0x4b0   :  { %v2078_v14 = vrot.slane %v2077_v0, 1  ;;  %v2143_v8 = vadd.f32 %v2142_v62, %v2141_v2  ;;  %v2120_v44 = vadd.f32 %v2119_v47, %v2106_v4  ;;  %v5216_v47 = vld [vmem:[%s6901_s13 + $0x98] sm:$0xff]   ;;  %v5217_v4 = vld [vmem:[%s6901_s13 + $0xe0] sm:$0xff]  }
 0x4b1   :  { %v2060_v24 = vadd.f32 %v2059_v54, %v2058_v22 }
 0x4b2   :  { %v2079_v30 = vadd.f32 %v2078_v14, %v2077_v0  ;;  %v2144_v18 = vrot.slane %v2143_v8, 1  ;;  %v2121_v54 = vrot.slane %v2120_v44, 4  ;;  %v5209_v14 = vld [vmem:[%s6901_s13 + $0xc0] sm:$0xff]  }
 0x4b4   :  { %2242 = vmatprep.mubr.f32.mxu0 %v2079_v30  ;;  %v2145_v41 = vadd.f32 %v2144_v18, %v2143_v8  ;;  %v2327_v8 = vld [vmem:[%s6903_s10] sm:$0x1]  ;;  %v5211_v18 = vld [vmem:[%s6901_s13 + $0xc8] sm:$0xff]  }
 0x4b5   :  { %2243 = vmatmul.mubr.f32.vlgmr.msra.gmra.mrb[8].mxu0 %v2060_v24  ;;  %v5213_v24 = vld [vmem:[%s6901_s13 + $0xd0] sm:$0xff]  }
 0x4b6   :  { %4946 = vmatpush3.bf16.msra.mxu0 %v6052_v36  ;;  %2314 = vmatprep.mubr.f32.mxu0 %v2145_v41  ;;  %v2122_v36 = vadd.f32 %v2121_v54, %v2120_v44  ;;  %v5214_v41 = vld [vmem:[%s6901_s13 + $0x90] sm:$0xff]   ;;  %v5218_v44 = vld [vmem:[%s6901_s13 + $0xa0] sm:$0xff]   ;;  %v5219_v54 = vld [vmem:[%s6901_s13 + $0xe8] sm:$0xff]  }
 0x4b7   :  { %4948 = vmatprep.subr.bf16.mxu0 %v6061_v39 }
 0x4b8   :  { %v2123_v62 = vrot.slane %v2122_v36, 2 }
 0x4ba   :  { %4950 = vmatpush3.bf16.msra.mxu0 %v6069_v42  ;;  %v2124_v39 = vadd.f32 %v2123_v62, %v2122_v36  ;;  %v5220_v36 = vld [vmem:[%s6901_s13 + $0xa8] sm:$0xff]   ;;  %v5221_v62 = vld [vmem:[%s6901_s13 + $0xf0] sm:$0xff]  }
 0x4bb   :  { %4952 = vmatprep.subr.bf16.mxu0 %v6082_v35 }
 0x4bc   :  { %v2125_v42 = vrot.slane %v2124_v39, 1 }
 0x4be   :  { %4954 = vmatpush3.bf16.msra.mxu0 %v6087_v46  ;;  %v2126_v35 = vadd.f32 %v2125_v42, %v2124_v39  ;;  %v6920_v46 = vmov 0.0   ;;  %v5222_v39 = vld [vmem:[%s6901_s13 + $0xb0] sm:$0xff]   ;;  %v5223_v42 = vld [vmem:[%s6901_s13 + $0xf8] sm:$0xff]  }
 0x4bf   :  { %4956 = vmatprep.subr.bf16.mxu0 %v6097_v50  ;;  %v2331_v50 = vld [vmem:[%s6900_s12 + $0x8] sm:$0xff] }
 0x4c2   :  { %4958 = vmatpush3.bf16.msra.mxu0 %v6105_v53  ;;  %v2333_v53 = vld [vmem:[%s6900_s12 + $0x18] sm:$0xff] }
 0x4c3   :  { %4960 = vmatprep.subr.bf16.mxu0 %v6115_v56  ;;  %v2330_v56 = vld [vmem:[%s6900_s12] sm:$0xff] }
 0x4c6   :  { %4962 = vmatpush3.bf16.msra.mxu0 %v6123_v59  ;;  %v4975_v59 = vpack.c.bf16 %v2333_v53, %v2331_v50 }
 0x4c7   :  { %4964 = vmatprep.subr.bf16.mxu0 %v6135_v63  ;;  %v2332_v63 = vld [vmem:[%s6900_s12 + $0x10] sm:$0xff] }
 0x4ca   :  { %4966 = vmatpush3.bf16.msra.mxu0 %v6147_v5  ;;  %v4977_v5 = vpack.c.bf16 %v2332_v63, %v2330_v56 }
 0x4cb   :  { %4968 = vmatprep.subr.bf16.mxu0 %v6150_v6 }
 0x4ce   :  { %4970 = vmatpush3.bf16.msra.mxu0 %v6165_v11 }
 0x4cf   :  { %4972 = vmatprep.subr.bf16.mxu0 %v6168_v12 }
 0x4d2   :  { %4974 = vmatpush3.bf16.msra.mxu0 %v6177_v15 }
 0x4d3   :  { %4976 = vmatprep.subr.bf16.mxu0 %v4975_v59 }
 0x4d5   :  { %2315 = vmatmul.mubr.f32.vlgmr.msra.gmra.mrb[10].mxu0 %v2126_v35  ;;  %v5224_v35 = vld [vmem:[%s6901_s13 + $0xb8] sm:$0xff]  }
 0x4d6   :  { %2402 = vmatprep.mubr.f32.mxu0 %v6920_v46  ;;  %4978 = vmatpush1.bf16.msra.mxu0 %v4977_v5 }
 0x4d7   :  { %4980 = vmatprep.subr.bf16.mxu0 %v4975_v59 }
 0x588   :  { %v4328_v6 = vpop.f32.mrb[8].mxu0 }
 0x589   :  { %v4329_v11 = vpop.f32.mrb[9].mxu0 }
 0x58a   :  { %v4330_v12 = vadd.f32 %v4329_v11, %v4328_v6 }
 0x58c   :  { %v2249_v15 = vmul.f32 0.0006377551, %v4330_v12 }
 0x58e   :  { %v2321_v58 = vmul.f32 %v2249_v15, %v2249_v15 }
 0x5a8   :  { %v4363_v0 = vpop.f32.mrb[10].mxu0 }
 0x5a9   :  { %v4364_v22 = vpop.f32.mrb[11].mxu0 }
 0x5aa   :  { %v4365_v29 = vadd.f32 %v4364_v22, %v4363_v0 }
 0x5ac   :  { %v2320_v23 = vmul.f32 0.0006377551, %v4365_v29 }
 0x5ae   :  { %v2322_v49 = vsub.f32 %v2320_v23, %v2321_v58 }
 0x5b0   :  { %v2323_v51 = vadd.f32 1e-05, %v2322_v49 }
 0x5b2   :  { %5257 = vrsqrt.f32 %v2323_v51 }
 0x5bc   :  { %v5258_v7 = vpop.eup %5257 }
 0x5bd   :  { %v2326_v2 = vmul.f32 %v5258_v7, %v2325_v1 }
 0x5bf   :  { %3964 = vmatmul.mubr.msk.f32.vlgmr.msra.gmra.mrb[12].mxu0 %vm2334_vm4, %v2326_v2  ;;  %v2328_v37 = vmul.f32 %v2326_v2, %v2249_v15 }
 0x5c0   :  { %4982 = vmatpush1.bf16.msra.mxu0 %v4977_v5  ;;  %2476 = vmatprep.mubr.f32.mxu0 %v6920_v46  ;;  %v5225_v46 = vld [vmem:[%s6901_s13 + $0x40] sm:$0xff]  }
 0x5c1   :  { %v2329_v30 = vsub.f32 %v2327_v8, %v2328_v37  ;;  %4366 = vmatprep.subr.bf16.mxu0 %v5209_v14 }
 0x5c3   :  { %3965 = vmatmul.mubr.msk.f32.vlgmr.msra.gmra.mrb[14].mxu0 %vm2334_vm4, %v2329_v30 }
 0x5c4   :  { %4367 = vmatpush3.bf16.msra.mxu0 %v5210_v13 }
 0x5c5   :  { %4368 = vmatprep.subr.bf16.mxu0 %v5211_v18 }
 0x5c8   :  { %4369 = vmatpush3.bf16.msra.mxu0 %v5212_v19 }
 0x5c9   :  { %4370 = vmatprep.subr.bf16.mxu0 %v5213_v24 }
 0x5cc   :  { %4371 = vmatpush3.bf16.msra.mxu0 %v5214_v41  ;;  %v5226_v41 = vld [vmem:[%s6901_s13] sm:$0xff]  }
 0x5cd   :  { %4372 = vmatprep.subr.bf16.mxu0 %v5215_v45 }
 0x5d0   :  { %4373 = vmatpush3.bf16.msra.mxu0 %v5216_v47 }
 0x5d1   :  { %4374 = vmatprep.subr.bf16.mxu0 %v5217_v4 }
 0x5d4   :  { %4375 = vmatpush3.bf16.msra.mxu0 %v5218_v44  ;;  %v5227_v44 = vld [vmem:[%s6901_s13 + $0x48] sm:$0xff]  }
 0x5d5   :  { %4376 = vmatprep.subr.bf16.mxu0 %v5219_v54 }
 0x5d8   :  { %4377 = vmatpush3.bf16.msra.mxu0 %v5220_v36 }
 0x5d9   :  { %4378 = vmatprep.subr.bf16.mxu0 %v5221_v62 }
 0x5dc   :  { %4379 = vmatpush3.bf16.msra.mxu0 %v5222_v39 }
 0x5dd   :  { %4380 = vmatprep.subr.bf16.mxu0 %v5223_v42 }
 0x5e0   :  { %4381 = vmatpush3.bf16.msra.mxu0 %v5224_v35 }
 0x5e1   :  { %4424 = vmatprep.subr.bf16.mxu0 %v5225_v46 }
 0x692   :  { %v2404_v50 = vpop.f32.mrb[12].mxu0 }
 0x693   :  { %v6446_v53 = vrot.slane %v2404_v50, %v6184_v25  ;;  %v2406_v56 = vpop.f32.mrb[13].mxu0 }
 0x694   :  { %v6449_v59 = vrot.slane %v2406_v56, %v6184_v25 }
 0x695   :  { %v2491_v63 = vmul.f32 %v6446_v53, %v6204_v38  ;;  %v2493_v5 = vmul.f32 %v6446_v53, %v6195_v32  ;;  %v2495_v6 = vmul.f32 %v6446_v53, %v6207_v40  ;;  %v2497_v11 = vmul.f32 %v6446_v53, %v6224_v55 }
 0x696   :  { %v2478_v12 = vpop.f32.mrb[14].mxu0  ;;  %v2492_v15 = vmul.f32 %v6449_v59, %v6198_v33  ;;  %v2494_v0 = vmul.f32 %v6449_v59, %v6192_v31  ;;  %v2496_v22 = vmul.f32 %v6449_v59, %v6201_v34  ;;  %v2498_v38 = vmul.f32 %v6449_v59, %v6220_v52 }
 0x697   :  { %v6468_v32 = vrot.slane %v2478_v12, %v6184_v25  ;;  %v2480_v40 = vpop.f32.mrb[15].mxu0  ;;  %v2500_v55 = vmul.f32 %v6449_v59, %v6228_v60  ;;  %v2502_v29 = vmul.f32 %v6449_v59, %v6240_v10  ;;  %v2499_v33 = vmul.f32 %v6446_v53, %v6231_v61 }
 0x698   :  { %v6477_v31 = vrot.slane %v2480_v40, %v6184_v25  ;;  %v2501_v34 = vmul.f32 %v6446_v53, %v6244_v16  ;;  %v2504_v52 = vmul.f32 %v6449_v59, %v6248_v20  ;;  %v2506_v58 = vmul.f32 %v6449_v59, %v6260_v28 }
 0x699   :  { %v6486_v60 = vadd.f32 %v6468_v32, %v2491_v63  ;;  %v2529_v10 = vadd.f32 %v6468_v32, %v2493_v5  ;;  %v2531_v23 = vadd.f32 %v6468_v32, %v2495_v6  ;;  %v6491_v61 = vadd.f32 %v6468_v32, %v2497_v11  ;;  %v5228_v11 = vld [vmem:[%s6901_s13 + $0x8] sm:$0xff]  }
 0x69a   :  { %v6494_v25 = vadd.f32 %v6477_v31, %v2492_v15  ;;  %v6497_v16 = vadd.f32 %v6477_v31, %v2494_v0  ;;  %v6500_v20 = vadd.f32 %v6477_v31, %v2496_v22  ;;  %v6503_v28 = vadd.f32 %v6477_v31, %v2498_v38 }
 0x69b   :  { %v2555_v49 = vmax.f32 %v6486_v60, 0.0  ;;  %v2557_v51 = vmax.f32 %v2529_v10, 0.0  ;;  %v2559_v1 = vmax.f32 %v2531_v23, 0.0  ;;  %v2561_v7 = vmax.f32 %v6491_v61, 0.0  ;;  %v6922_v10 = vld [vmem:[#allocation5_spill] sm:$0xff] }
 0x69c   :  { %v2556_v2 = vmax.f32 %v6494_v25, 0.0  ;;  %v2558_v14 = vmax.f32 %v6497_v16, 0.0  ;;  %v2560_v8 = vmax.f32 %v6500_v20, 0.0  ;;  %v2562_v37 = vmax.f32 %v6503_v28, 0.0  ;;  %v5235_v28 = vld [vmem:[%s6901_s13 + $0x68] sm:$0xff]   ;;  %v5237_v60 = vld [vmem:[%s6901_s13 + $0x70] sm:$0xff]  }
 0x69d   :  { %v4163_v13 = vpack.c.bf16 %v2557_v51, %v2555_v49  ;;  %v4165_v30 = vpack.c.bf16 %v2561_v7, %v2559_v1  ;;  %v6515_v18 = vpack.c.bf16 %v2559_v1, %v2557_v51  ;;  %v6518_v19 = vadd.f32 %v6477_v31, %v2500_v55  ;;  %v6923_v51 = vld [vmem:[#allocation6_spill] sm:$0xff]  ;;  %v5230_v1 = vld [vmem:[%s6901_s13 + $0x10] sm:$0xff]  }
 0x69e   :  { %v4164_v24 = vpack.c.bf16 %v2558_v14, %v2556_v2  ;;  %v4166_v45 = vpack.c.bf16 %v2562_v37, %v2560_v8  ;;  %v6532_v47 = vadd.f32 %v6477_v31, %v2502_v29  ;;  %v6535_v4 = vadd.f32 %v6468_v32, %v2499_v33  ;;  %v6921_v29 = vld [vmem:[#allocation4_spill] sm:$0xff]  ;;  %v5238_v25 = vld [vmem:[%s6901_s13 + $0x30] sm:$0xff]  }
 0x69f   :  { %v2564_v54 = vmax.f32 %v6518_v19, 0.0  ;;  %v6542_v36 = vadd.f32 %v6468_v32, %v2501_v34  ;;  %v6545_v62 = vadd.f32 %v6477_v31, %v2504_v52  ;;  %v6548_v39 = vadd.f32 %v6477_v31, %v2506_v58 }
 0x6a0   :  { %2977 = vmatprep.mubr.bf16.mxu0 %v4164_v24  ;;  %v2566_v42 = vmax.f32 %v6532_v47, 0.0  ;;  %v2563_v35 = vmax.f32 %v6535_v4, 0.0  ;;  %v2503_v46 = vmul.f32 %v6446_v53, %v6251_v21  ;;  %v2505_v50 = vmul.f32 %v6446_v53, %v6264_v43 }
 0x6a1   :  { %2978 = vmatmul.mubr.bf16.vlgmr.msra.gmra.mrb[16].mxu0 %v4163_v13  ;;  %v2565_v56 = vmax.f32 %v6542_v36, 0.0  ;;  %v2568_v63 = vmax.f32 %v6545_v62, 0.0  ;;  %v2570_v5 = vmax.f32 %v6548_v39, 0.0  ;;  %v2508_v6 = vmul.f32 %v6449_v59, %v6268_v48  ;;  %v5229_v48 = vld [vmem:[%s6901_s13 + $0x50] sm:$0xff]  }
 0x6a2   :  { %4425 = vmatpush3.bf16.msra.mxu0 %v5226_v41  ;;  %2985 = vmatprep.mubr.bf16.mxu0 %v4166_v45  ;;  %v4168_v21 = vpack.c.bf16 %v2566_v42, %v2564_v54  ;;  %v6569_v43 = vadd.f32 %v6468_v32, %v2503_v46  ;;  %v6572_v12 = vadd.f32 %v6468_v32, %v2505_v50  ;;  %v5231_v45 = vld [vmem:[%s6901_s13 + $0x58] sm:$0xff]  }
 0x6a3   :  { %4426 = vmatprep.subr.bf16.mxu0 %v5227_v44  ;;  %v6581_v15 = vpack.c.bf16 %v2565_v56, %v2563_v35  ;;  %v6587_v0 = vpack.c.bf16 %v2570_v5, %v2568_v63  ;;  %v2510_v22 = vmul.f32 %v6449_v59, %v6286_v9  ;;  %v2544_v38 = vadd.f32 %v6477_v31, %v2508_v6 }
 0x6a4   :  { %v2567_v40 = vmax.f32 %v6569_v43, 0.0  ;;  %v2569_v55 = vmax.f32 %v6572_v12, 0.0  ;;  %v2507_v33 = vmul.f32 %v6446_v53, %v6921_v29  ;;  %v2509_v34 = vmul.f32 %v6446_v53, %v6290_v17 }
 0x6a5   :  { %v2546_v52 = vadd.f32 %v6477_v31, %v2510_v22  ;;  %v2572_v58 = vmax.f32 %v2544_v38, 0.0  ;;  %v2512_v23 = vmul.f32 %v6449_v59, %v6922_v10  ;;  %v2514_v9 = vmul.f32 %v6449_v59, %v6923_v51  ;;  %v6924_v22 = vld [vmem:[#allocation7_spill] sm:$0xff]  ;;  %v6925_v10 = vld [vmem:[#allocation8_spill] sm:$0xff] }
 0x6a6   :  { %4427 = vmatpush3.bf16.msra.mxu0 %v5228_v11  ;;  %v6606_v13 = vpack.c.bf16 %v2569_v55, %v2567_v40  ;;  %v2543_v24 = vadd.f32 %v6468_v32, %v2507_v33  ;;  %v2545_v17 = vadd.f32 %v6468_v32, %v2509_v34  ;;  %v2511_v41 = vmul.f32 %v6446_v53, %v6296_v26  ;;  %v5232_v34 = vld [vmem:[%s6901_s13 + $0x18] sm:$0xff]  }
 0x6a7   :  { %4428 = vmatprep.subr.bf16.mxu0 %v5229_v48  ;;  %v2574_v44 = vmax.f32 %v2546_v52, 0.0  ;;  %v2548_v46 = vadd.f32 %v6477_v31, %v2512_v23  ;;  %v2550_v50 = vadd.f32 %v6477_v31, %v2514_v9  ;;  %v2513_v6 = vmul.f32 %v6446_v53, %v6314_v3 }
 0x6a8   :  { %v2571_v11 = vmax.f32 %v2543_v24, 0.0  ;;  %v2573_v43 = vmax.f32 %v2545_v17, 0.0  ;;  %v2547_v12 = vadd.f32 %v6468_v32, %v2511_v41  ;;  %v2516_v26 = vmul.f32 %v6449_v59, %v6924_v22 }
 0x6a9   :  { %2986 = vmatmul.mubr.bf16.gmra.mrb[20].mxu0 %v4165_v30  ;;  %v4172_v48 = vpack.c.bf16 %v2574_v44, %v2572_v58  ;;  %v2576_v38 = vmax.f32 %v2548_v46, 0.0  ;;  %v2578_v29 = vmax.f32 %v2550_v50, 0.0  ;;  %v2549_v33 = vadd.f32 %v6468_v32, %v2513_v6  ;;  %v5233_v30 = vld [vmem:[%s6901_s13 + $0x60] sm:$0xff]   ;;  %v5252_v50 = vld [vmem:[%s6901_s13 + $0x128] sm:$0xff]   ;;  %v5253_v6 = vld [vmem:[%s6901_s13 + $0x170] sm:$0xff]  }
 0x6aa   :  { %2993 = vmatprep.mubr.bf16.mxu0 %v4168_v21  ;;  %4429 = vmatpush3.bf16.msra.mxu0 %v5230_v1  ;;  %v4171_v3 = vpack.c.bf16 %v2573_v43, %v2571_v11  ;;  %v2575_v52 = vmax.f32 %v2547_v12, 0.0  ;;  %v2518_v23 = vmul.f32 %v6449_v59, %v6925_v10  ;;  %v2552_v51 = vadd.f32 %v6477_v31, %v2516_v26  ;;  %v5256_v12 = vld [vmem:[%s6901_s13 + $0x138] sm:$0xff]  }
 0x6ab   :  { %4430 = vmatprep.subr.bf16.mxu0 %v5231_v45  ;;  %v4174_v9 = vpack.c.bf16 %v2578_v29, %v2576_v38  ;;  %v2577_v24 = vmax.f32 %v2549_v33, 0.0  ;;  %v2515_v21 = vmul.f32 %v6446_v53, %v6325_v27  ;;  %v2517_v1 = vmul.f32 %v6446_v53, %v6333_v57 }
 0x6ac   :  { %v2554_v17 = vadd.f32 %v6477_v31, %v2518_v23  ;;  %v2580_v41 = vmax.f32 %v2552_v51, 0.0  ;;  %v6641_v59 = vpack.c.bf16 %v2560_v8, %v2558_v14  ;;  %v6647_v45 = vpack.c.bf16 %v2564_v54, %v2562_v37  ;;  %v5234_v31 = vld [vmem:[%s6901_s13 + $0x20] sm:$0xff]  }
 0x6ad   :  { %v4173_v46 = vpack.c.bf16 %v2577_v24, %v2575_v52  ;;  %v2551_v27 = vadd.f32 %v6468_v32, %v2515_v21  ;;  %v2553_v57 = vadd.f32 %v6468_v32, %v2517_v1  ;;  %v6655_v53 = vpack.c.bf16 %v2563_v35, %v2561_v7  ;;  %v5241_v35 = vld [vmem:[%s6901_s13 + $0x140] sm:$0xff]  }
 0x6ae   :  { %4431 = vmatpush3.bf16.msra.mxu0 %v5232_v34  ;;  %v2582_v16 = vmax.f32 %v2554_v17, 0.0  ;;  %v6664_v20 = vpack.c.bf16 %v2568_v63, %v2566_v42  ;;  %v6668_v32 = vpack.c.bf16 %v2567_v40, %v2565_v56  ;;  %v6672_v61 = vpack.c.bf16 %v2572_v58, %v2570_v5  ;;  %v5236_v42 = vld [vmem:[%s6901_s13 + $0x28] sm:$0xff]   ;;  %v5242_v56 = vld [vmem:[%s6901_s13 + $0x100] sm:$0xff]   ;;  %v5247_v40 = vld [vmem:[%s6901_s13 + $0x158] sm:$0xff]  }
 0x6af   :  { %4432 = vmatprep.subr.bf16.mxu0 %v5233_v30  ;;  %v2579_v7 = vmax.f32 %v2551_v27, 0.0  ;;  %v2581_v14 = vmax.f32 %v2553_v57, 0.0  ;;  %v6677_v8 = vpack.c.bf16 %v2571_v11, %v2569_v55  ;;  %v6679_v37 = vpack.c.bf16 %v2576_v38, %v2574_v44  ;;  %v5243_v63 = vld [vmem:[%s6901_s13 + $0x148] sm:$0xff]   ;;  %v5248_v55 = vld [vmem:[%s6901_s13 + $0x118] sm:$0xff]   ;;  %v5249_v58 = vld [vmem:[%s6901_s13 + $0x160] sm:$0xff]  }
 0x6b0   :  { %v4176_v19 = vpack.c.bf16 %v2582_v16, %v2580_v41  ;;  %v6681_v47 = vpack.c.bf16 %v2575_v52, %v2573_v43  ;;  %v6683_v4 = vpack.c.bf16 %v2580_v41, %v2578_v29  ;;  %v6689_v54 = vpack.c.bf16 %v2556_v2, %v2555_v49  ;;  %v5239_v49 = vld [vmem:[%s6901_s13 + $0x78] sm:$0xff]   ;;  %v5244_v5 = vld [vmem:[%s6901_s13 + $0x108] sm:$0xff]   ;;  %v5254_v11 = vld [vmem:[%s6901_s13 + $0x130] sm:$0xff]  }
 0x6b1   :  { %2994 = vmatmul.mubr.bf16.gmra.mrb[24].mxu0 %v6581_v15  ;;  %v4175_v36 = vpack.c.bf16 %v2581_v14, %v2579_v7  ;;  %v6692_v62 = vpack.c.bf16 %v2579_v7, %v2577_v24  ;;  %v6694_v39 = vpack.c.bf16 %v2582_v16, %v2581_v14  ;;  %v5240_v2 = vld [vmem:[%s6901_s13 + $0x38] sm:$0xff]   ;;  %v5245_v15 = vld [vmem:[%s6901_s13 + $0x150] sm:$0xff]   ;;  %v5251_v44 = vld [vmem:[%s6901_s13 + $0x168] sm:$0xff]   ;;  %v6926_v22 = vmov 0  }
 0x6b2   :  { %3001 = vmatprep.mubr.bf16.mxu0 %v6587_v0  ;;  %4433 = vmatpush3.bf16.msra.mxu0 %v5234_v31  ;;  %v5246_v0 = vld [vmem:[%s6901_s13 + $0x110] sm:$0xff]   ;;  %v5255_v43 = vld [vmem:[%s6901_s13 + $0x178] sm:$0xff]   ;;  %v4105_v38 = vcombine.high %v6926_v22, %v6689_v54  ;;  %v4104_v29 = vcombine.low %v6926_v22, %v6689_v54 }
 0x6b3   :  { %4434 = vmatprep.subr.bf16.mxu0 %v5235_v28  ;;  %v4055_v26 = vcombine.high %v6694_v39, %v6926_v22 }
 0x6b6   :  { %4435 = vmatpush3.bf16.msra.mxu0 %v5236_v42 }
 0x6b7   :  { %4436 = vmatprep.subr.bf16.mxu0 %v5237_v60 }
 0x6b9   :  { %3002 = vmatmul.mubr.bf16.gmra.mrb[28].mxu0 %v6606_v13  ;;  %v5250_v13 = vld [vmem:[%s6901_s13 + $0x120] sm:$0xff]  }
 0x6ba   :  { %3009 = vmatprep.mubr.bf16.mxu0 %v4172_v48  ;;  %4437 = vmatpush3.bf16.msra.mxu0 %v5238_v25  ;;  %v4054_v48 = vcombine.low %v6694_v39, %v6926_v22 }
 0x6bb   :  { %4438 = vmatprep.subr.bf16.mxu0 %v5239_v49 }
 0x6be   :  { %4439 = vmatpush3.bf16.msra.mxu0 %v5240_v2 }
 0x6bf   :  { %4482 = vmatprep.subr.bf16.mxu0 %v5241_v35 }
 0x6c1   :  { %3010 = vmatmul.mubr.bf16.gmra.mrb[32].mxu0 %v4171_v3 }
 0x6c2   :  { %3017 = vmatprep.mubr.bf16.mxu0 %v4174_v9 }
 0x6c9   :  { %3018 = vmatmul.mubr.bf16.gmra.mrb[36].mxu0 %v4173_v46 }
 0x6ca   :  { %3025 = vmatprep.mubr.bf16.mxu0 %v4176_v19 }
 0x6d1   :  { %3026 = vmatmul.mubr.bf16.gmra.mrb[40].mxu0 %v4175_v36 }
 0x6d2   :  { %3232 = vmatprep.mubr.bf16.mxu0 %v6641_v59 }
 0x6d9   :  { %3233 = vmatmul.mubr.bf16.vlgmr.msra.gmra.mrb[44].mxu0 %v6515_v18 }
 0x6da   :  { %4483 = vmatpush3.bf16.msra.mxu0 %v5242_v56  ;;  %3240 = vmatprep.mubr.bf16.mxu0 %v6647_v45 }
 0x6db   :  { %4484 = vmatprep.subr.bf16.mxu0 %v5243_v63 }
 0x6de   :  { %4485 = vmatpush3.bf16.msra.mxu0 %v5244_v5 }
 0x6df   :  { %4486 = vmatprep.subr.bf16.mxu0 %v5245_v15 }
 0x6e1   :  { %3241 = vmatmul.mubr.bf16.gmra.mrb[48].mxu0 %v6655_v53 }
 0x6e2   :  { %3248 = vmatprep.mubr.bf16.mxu0 %v6664_v20  ;;  %4487 = vmatpush3.bf16.msra.mxu0 %v5246_v0 }
 0x6e3   :  { %4488 = vmatprep.subr.bf16.mxu0 %v5247_v40 }
 0x6e6   :  { %4489 = vmatpush3.bf16.msra.mxu0 %v5248_v55 }
 0x6e7   :  { %4490 = vmatprep.subr.bf16.mxu0 %v5249_v58 }
 0x6e9   :  { %3249 = vmatmul.mubr.bf16.gmra.mrb[52].mxu0 %v6668_v32 }
 0x6ea   :  { %3256 = vmatprep.mubr.bf16.mxu0 %v6672_v61  ;;  %4491 = vmatpush3.bf16.msra.mxu0 %v5250_v13 }
 0x6eb   :  { %4492 = vmatprep.subr.bf16.mxu0 %v5251_v44 }
 0x6ee   :  { %4493 = vmatpush3.bf16.msra.mxu0 %v5252_v50 }
 0x6ef   :  { %4494 = vmatprep.subr.bf16.mxu0 %v5253_v6 }
 0x6f1   :  { %3257 = vmatmul.mubr.bf16.gmra.mrb[56].mxu0 %v6677_v8 }
 0x6f2   :  { %3264 = vmatprep.mubr.bf16.mxu0 %v6679_v37  ;;  %4495 = vmatpush3.bf16.msra.mxu0 %v5254_v11 }
 0x6f3   :  { %4496 = vmatprep.subr.bf16.mxu0 %v5255_v43 }
 0x6f6   :  { %4497 = vmatpush3.bf16.msra.mxu0 %v5256_v12 }
 0x6f9   :  { %3265 = vmatmul.mubr.bf16.gmra.mrb[60].mxu0 %v6681_v47 }
 0x6fa   :  { %3272 = vmatprep.mubr.bf16.mxu0 %v6683_v4 }
 0x701   :  { %3273 = vmatmul.mubr.bf16.gmra.mrb[64].mxu0 %v6692_v62 }
 0x702   :  { %3280 = vmatprep.mubr.bf16.mxu0 %v4055_v26 }
 0x709   :  { %3281 = vmatmul.mubr.bf16.gmra.mrb[68].mxu0 %v4054_v48 }
 0x70a   :  { %3534 = vmatprep.mubr.bf16.mxu0 %v4105_v38 }
 0x711   :  { %3535 = vmatmul.mubr.bf16.vlgmr.msra.gmra.mrb[72].mxu0 %v4104_v29 }
 0x712   :  { %3542 = vmatprep.mubr.bf16.mxu0 %v6641_v59 }
 0x719   :  { %3543 = vmatmul.mubr.bf16.gmra.mrb[76].mxu0 %v6515_v18 }
 0x71a   :  { %3550 = vmatprep.mubr.bf16.mxu0 %v6647_v45 }
 0x721   :  { %3551 = vmatmul.mubr.bf16.gmra.mrb[80].mxu0 %v6655_v53 }
 0x722   :  { %3558 = vmatprep.mubr.bf16.mxu0 %v6664_v20 }
 0x729   :  { %3559 = vmatmul.mubr.bf16.gmra.mrb[84].mxu0 %v6668_v32 }
 0x72a   :  { %3566 = vmatprep.mubr.bf16.mxu0 %v6672_v61 }
 0x731   :  { %3567 = vmatmul.mubr.bf16.gmra.mrb[88].mxu0 %v6677_v8 }
 0x732   :  { %3574 = vmatprep.mubr.bf16.mxu0 %v6679_v37 }
 0x739   :  { %3575 = vmatmul.mubr.bf16.gmra.mrb[92].mxu0 %v6681_v47 }
 0x73a   :  { %3582 = vmatprep.mubr.bf16.mxu0 %v6683_v4 }
 0x741   :  { %3583 = vmatmul.mubr.bf16.gmra.mrb[96].mxu0 %v6692_v62 }
 0x774   :  { %v4382_v18 = vpop.f32.mrb[16].mxu0 }
 0x775   :  { %v4383_v33 = vpop.f32.mrb[17].mxu0 }
 0x776   :  { %v4384_v34 = vadd.f32 %v4383_v33, %v4382_v18  ;;  %v4385_v3 = vpop.f32.mrb[18].mxu0 }
 0x777   :  { %v4386_v52 = vpop.f32.mrb[19].mxu0 }
 0x778   :  { %v4387_v10 = vadd.f32 %v4386_v52, %v4385_v3 }
 0x77c   :  { %v4388_v23 = vpop.f32.mrb[20].mxu0 }
 0x77d   :  { %v4389_v51 = vpop.f32.mrb[21].mxu0 }
 0x77e   :  { %v4390_v30 = vadd.f32 %v4389_v51, %v4388_v23  ;;  %v4391_v9 = vpop.f32.mrb[22].mxu0 }
 0x77f   :  { %v4392_v24 = vpop.f32.mrb[23].mxu0 }
 0x780   :  { %v4393_v21 = vadd.f32 %v4392_v24, %v4391_v9 }
 0x784   :  { %v4394_v1 = vpop.f32.mrb[24].mxu0 }
 0x785   :  { %v4395_v17 = vpop.f32.mrb[25].mxu0 }
 0x786   :  { %v4396_v41 = vadd.f32 %v4395_v17, %v4394_v1  ;;  %v4397_v59 = vpop.f32.mrb[26].mxu0 }
 0x787   :  { %v4398_v45 = vpop.f32.mrb[27].mxu0 }
 0x788   :  { %v4399_v46 = vadd.f32 %v4398_v45, %v4397_v59 }
 0x78c   :  { %v4400_v27 = vpop.f32.mrb[28].mxu0 }
 0x78d   :  { %v4401_v57 = vpop.f32.mrb[29].mxu0 }
 0x78e   :  { %v4402_v53 = vadd.f32 %v4401_v57, %v4400_v27  ;;  %v4403_v31 = vpop.f32.mrb[30].mxu0 }
 0x78f   :  { %v4404_v16 = vpop.f32.mrb[31].mxu0 }
 0x790   :  { %v4405_v20 = vadd.f32 %v4404_v16, %v4403_v31 }
 0x794   :  { %v4406_v32 = vpop.f32.mrb[32].mxu0 }
 0x795   :  { %v4407_v61 = vpop.f32.mrb[33].mxu0 }
 0x796   :  { %v4408_v28 = vadd.f32 %v4407_v61, %v4406_v32  ;;  %v4409_v7 = vpop.f32.mrb[34].mxu0 }
 0x797   :  { %v4410_v14 = vpop.f32.mrb[35].mxu0 }
 0x798   :  { %v4411_v8 = vadd.f32 %v4410_v14, %v4409_v7 }
 0x79c   :  { %v4412_v37 = vpop.f32.mrb[36].mxu0 }
 0x79d   :  { %v4413_v19 = vpop.f32.mrb[37].mxu0 }
 0x79e   :  { %v4414_v47 = vadd.f32 %v4413_v19, %v4412_v37  ;;  %v4415_v4 = vpop.f32.mrb[38].mxu0 }
 0x79f   :  { %v4416_v54 = vpop.f32.mrb[39].mxu0 }
 0x7a0   :  { %v4417_v36 = vadd.f32 %v4416_v54, %v4415_v4 }
 0x7a4   :  { %v4418_v62 = vpop.f32.mrb[40].mxu0 }
 0x7a5   :  { %v4419_v39 = vpop.f32.mrb[41].mxu0 }
 0x7a6   :  { %v4420_v42 = vadd.f32 %v4419_v39, %v4418_v62  ;;  %v4421_v60 = vpop.f32.mrb[42].mxu0 }
 0x7a7   :  { %v4422_v25 = vpop.f32.mrb[43].mxu0 }
 0x7a8   :  { %v4423_v49 = vadd.f32 %v4422_v25, %v4421_v60 }
 0x7ac   :  { %v4440_v2 = vpop.f32.mrb[44].mxu0 }
 0x7ad   :  { %v4441_v35 = vpop.f32.mrb[45].mxu0 }
 0x7ae   :  { %v4442_v56 = vadd.f32 %v4441_v35, %v4440_v2  ;;  %v4443_v63 = vpop.f32.mrb[46].mxu0 }
 0x7af   :  { %v4444_v5 = vpop.f32.mrb[47].mxu0 }
 0x7b0   :  { %v3235_v15 = vadd.f32 %v4442_v56, %v4384_v34  ;;  %v4445_v0 = vadd.f32 %v4444_v5, %v4443_v63 }
 0x7b2   :  { %v3238_v40 = vadd.f32 %v4445_v0, %v4387_v10 }
 0x7b4   :  { %v4446_v55 = vpop.f32.mrb[48].mxu0 }
 0x7b5   :  { %v4447_v58 = vpop.f32.mrb[49].mxu0 }
 0x7b6   :  { %v4448_v13 = vadd.f32 %v4447_v58, %v4446_v55  ;;  %v4449_v44 = vpop.f32.mrb[50].mxu0 }
 0x7b7   :  { %v4450_v50 = vpop.f32.mrb[51].mxu0 }
 0x7b8   :  { %v6793_v6 = vadd.f32 %v4448_v13, %v4390_v30  ;;  %v4451_v11 = vadd.f32 %v4450_v50, %v4449_v44 }
 0x7ba   :  { %v6795_v43 = vadd.f32 %v4451_v11, %v4393_v21 }
 0x7bc   :  { %v4452_v12 = vpop.f32.mrb[52].mxu0 }
 0x7bd   :  { %v4453_v22 = vpop.f32.mrb[53].mxu0 }
 0x7be   :  { %v4454_v26 = vadd.f32 %v4453_v22, %v4452_v12  ;;  %v4455_v48 = vpop.f32.mrb[54].mxu0 }
 0x7bf   :  { %v4456_v38 = vpop.f32.mrb[55].mxu0 }
 0x7c0   :  { %v6797_v29 = vadd.f32 %v4454_v26, %v4396_v41  ;;  %v4457_v18 = vadd.f32 %v4456_v38, %v4455_v48 }
 0x7c2   :  { %v6799_v33 = vadd.f32 %v4457_v18, %v4399_v46 }
 0x7c4   :  { %v4458_v34 = vpop.f32.mrb[56].mxu0 }
 0x7c5   :  { %v4459_v3 = vpop.f32.mrb[57].mxu0 }
 0x7c6   :  { %v4460_v52 = vadd.f32 %v4459_v3, %v4458_v34  ;;  %v4461_v10 = vpop.f32.mrb[58].mxu0 }
 0x7c7   :  { %v4462_v23 = vpop.f32.mrb[59].mxu0 }
 0x7c8   :  { %v6801_v51 = vadd.f32 %v4460_v52, %v4402_v53  ;;  %v4463_v30 = vadd.f32 %v4462_v23, %v4461_v10 }
 0x7ca   :  { %v6803_v9 = vadd.f32 %v4463_v30, %v4405_v20 }
 0x7cc   :  { %v4464_v24 = vpop.f32.mrb[60].mxu0 }
 0x7cd   :  { %v4465_v21 = vpop.f32.mrb[61].mxu0 }
 0x7ce   :  { %v4466_v1 = vadd.f32 %v4465_v21, %v4464_v24  ;;  %v4467_v17 = vpop.f32.mrb[62].mxu0 }
 0x7cf   :  { %v4468_v59 = vpop.f32.mrb[63].mxu0 }
 0x7d0   :  { %v6805_v41 = vadd.f32 %v4466_v1, %v4408_v28  ;;  %v4469_v45 = vadd.f32 %v4468_v59, %v4467_v17 }
 0x7d2   :  { %v6807_v46 = vadd.f32 %v4469_v45, %v4411_v8 }
 0x7d4   :  { %v4470_v27 = vpop.f32.mrb[64].mxu0 }
 0x7d5   :  { %v4471_v57 = vpop.f32.mrb[65].mxu0 }
 0x7d6   :  { %v4472_v31 = vadd.f32 %v4471_v57, %v4470_v27  ;;  %v4473_v16 = vpop.f32.mrb[66].mxu0 }
 0x7d7   :  { %v4474_v32 = vpop.f32.mrb[67].mxu0 }
 0x7d8   :  { %v6809_v53 = vadd.f32 %v4472_v31, %v4414_v47  ;;  %v4475_v61 = vadd.f32 %v4474_v32, %v4473_v16  ;;  %v6820_v47 = vld [vmem:[%s6904_s14] ss:$0 sm:$0xff] }
 0x7da   :  { %v6811_v20 = vadd.f32 %v4475_v61, %v4417_v36 }
 0x7dc   :  { %v4476_v7 = vpop.f32.mrb[68].mxu0 }
 0x7dd   :  { %v4477_v14 = vpop.f32.mrb[69].mxu0 }
 0x7de   :  { %v4478_v37 = vadd.f32 %v4477_v14, %v4476_v7  ;;  %v4479_v19 = vpop.f32.mrb[70].mxu0 }
 0x7df   :  { %v4480_v4 = vpop.f32.mrb[71].mxu0 }
 0x7e0   :  { %v6813_v28 = vadd.f32 %v4478_v37, %v4420_v42  ;;  %v4481_v54 = vadd.f32 %v4480_v4, %v4479_v19 }
 0x7e2   :  { %v6815_v8 = vadd.f32 %v4481_v54, %v4423_v49 }
 0x7e4   :  { %v4498_v62 = vpop.f32.mrb[72].mxu0 }
 0x7e5   :  { %v4499_v39 = vpop.f32.mrb[73].mxu0 }
 0x7e6   :  { %v4500_v60 = vadd.f32 %v4499_v39, %v4498_v62  ;;  %v4501_v25 = vpop.f32.mrb[74].mxu0 }
 0x7e7   :  { %v4502_v36 = vpop.f32.mrb[75].mxu0 }
 0x7e8   :  { %v3591_v2 = vadd.f32 %v4500_v60, %v3235_v15  ;;  %v4503_v35 = vadd.f32 %v4502_v36, %v4501_v25 }
 0x7ea   :  { %v3612_v56 = vadd.f32 %v6820_v47, %v3591_v2  ;;  %v3592_v63 = vadd.f32 %v4503_v35, %v3238_v40 }
 0x7ec   :  { %v4135_v42 = vmul.f32 -1.442695, %v3612_v56  ;;  %v3613_v5 = vadd.f32 %v6820_v47, %v3592_v63  ;;  %v4504_v49 = vpop.f32.mrb[76].mxu0 }
 0x7ed   :  { %v4505_v0 = vpop.f32.mrb[77].mxu0 }
 0x7ee   :  { %5259 = vpow2.f32 %v4135_v42  ;;  %v4136_v55 = vmul.f32 -1.442695, %v3613_v5  ;;  %v4506_v58 = vadd.f32 %v4505_v0, %v4504_v49  ;;  %v4507_v13 = vpop.f32.mrb[78].mxu0 }
 0x7ef   :  { %v4508_v44 = vpop.f32.mrb[79].mxu0 }
 0x7f0   :  { %5261 = vpow2.f32 %v4136_v55  ;;  %v3593_v50 = vadd.f32 %v4506_v58, %v6793_v6  ;;  %v4509_v11 = vadd.f32 %v4508_v44, %v4507_v13 }
 0x7f2   :  { %v3614_v15 = vadd.f32 %v6820_v47, %v3593_v50  ;;  %v3594_v12 = vadd.f32 %v4509_v11, %v6795_v43 }
 0x7f4   :  { %v4137_v22 = vmul.f32 -1.442695, %v3614_v15  ;;  %v3615_v40 = vadd.f32 %v6820_v47, %v3594_v12  ;;  %v4510_v26 = vpop.f32.mrb[80].mxu0 }
 0x7f5   :  { %v4511_v48 = vpop.f32.mrb[81].mxu0 }
 0x7f6   :  { %5263 = vpow2.f32 %v4137_v22  ;;  %v4138_v38 = vmul.f32 -1.442695, %v3615_v40  ;;  %v4512_v18 = vadd.f32 %v4511_v48, %v4510_v26  ;;  %v4513_v34 = vpop.f32.mrb[82].mxu0 }
 0x7f7   :  { %v4514_v3 = vpop.f32.mrb[83].mxu0 }
 0x7f8   :  { %v5260_v52 = vpop.eup %5259  ;;  %5265 = vpow2.f32 %v4138_v38  ;;  %v3595_v10 = vadd.f32 %v4512_v18, %v6797_v29  ;;  %v4515_v6 = vadd.f32 %v4514_v3, %v4513_v34 }
 0x7f9   :  { %v3668_v23 = vadd.f32 1.0, %v5260_v52 }
 0x7fa   :  { %v5262_v30 = vpop.eup %5261  ;;  %v3616_v24 = vadd.f32 %v6820_v47, %v3595_v10  ;;  %v3596_v43 = vadd.f32 %v4515_v6, %v6799_v33 }
 0x7fb   :  { %5267 = vrcp.f32 %v3668_v23  ;;  %v3669_v21 = vadd.f32 1.0, %v5262_v30 }
 0x7fc   :  { %v4139_v1 = vmul.f32 -1.442695, %v3616_v24  ;;  %v3617_v17 = vadd.f32 %v6820_v47, %v3596_v43  ;;  %v4516_v59 = vpop.f32.mrb[84].mxu0 }
 0x7fd   :  { %5269 = vrcp.f32 %v3669_v21  ;;  %v4517_v45 = vpop.f32.mrb[85].mxu0 }
 0x7fe   :  { %5271 = vpow2.f32 %v4139_v1  ;;  %v4140_v27 = vmul.f32 -1.442695, %v3617_v17  ;;  %v4518_v57 = vadd.f32 %v4517_v45, %v4516_v59  ;;  %v4519_v31 = vpop.f32.mrb[86].mxu0 }
 0x7ff   :  { %v4520_v29 = vpop.f32.mrb[87].mxu0 }
 0x800   :  { %v5264_v16 = vpop.eup %5263  ;;  %5273 = vpow2.f32 %v4140_v27  ;;  %v3597_v32 = vadd.f32 %v4518_v57, %v6801_v51  ;;  %v4521_v61 = vadd.f32 %v4520_v29, %v4519_v31 }
 0x801   :  { %v3670_v7 = vadd.f32 1.0, %v5264_v16 }
 0x802   :  { %v5266_v33 = vpop.eup %5265  ;;  %v3618_v14 = vadd.f32 %v6820_v47, %v3597_v32  ;;  %v3598_v37 = vadd.f32 %v4521_v61, %v6803_v9 }
 0x803   :  { %5275 = vrcp.f32 %v3670_v7  ;;  %v3671_v19 = vadd.f32 1.0, %v5266_v33 }
 0x804   :  { %v4141_v4 = vmul.f32 -1.442695, %v3618_v14  ;;  %v3619_v54 = vadd.f32 %v6820_v47, %v3598_v37  ;;  %v4522_v62 = vpop.f32.mrb[88].mxu0 }
 0x805   :  { %v5268_v39 = vpop.eup %5267  ;;  %5277 = vrcp.f32 %v3671_v19  ;;  %v4523_v60 = vpop.f32.mrb[89].mxu0 }
 0x806   :  { %3710 = vst [vmem:[%s6905_s15] sm:$0xff] %v5268_v39  ;;  %5279 = vpow2.f32 %v4141_v4  ;;  %v4142_v51 = vmul.f32 -1.442695, %v3619_v54  ;;  %v4524_v25 = vadd.f32 %v4523_v60, %v4522_v62  ;;  %v4525_v36 = vpop.f32.mrb[90].mxu0 }
 0x807   :  { %v5270_v2 = vpop.eup %5269  ;;  %v4526_v35 = vpop.f32.mrb[91].mxu0 }
 0x808   :  { %v5272_v9 = vpop.eup %5271  ;;  %3711 = vst [vmem:[%s6905_s15 + $0x8] sm:$0xff] %v5270_v2  ;;  %5281 = vpow2.f32 %v4142_v51  ;;  %v3599_v56 = vadd.f32 %v4524_v25, %v6805_v41  ;;  %v4527_v63 = vadd.f32 %v4526_v35, %v4525_v36 }
 0x809   :  { %v3672_v42 = vadd.f32 1.0, %v5272_v9 }
 0x80a   :  { %v5274_v5 = vpop.eup %5273  ;;  %v3620_v49 = vadd.f32 %v6820_v47, %v3599_v56  ;;  %v3600_v0 = vadd.f32 %v4527_v63, %v6807_v46 }
 0x80b   :  { %5283 = vrcp.f32 %v3672_v42  ;;  %v3673_v55 = vadd.f32 1.0, %v5274_v5 }
 0x80c   :  { %v4143_v58 = vmul.f32 -1.442695, %v3620_v49  ;;  %v3621_v13 = vadd.f32 %v6820_v47, %v3600_v0  ;;  %v4528_v44 = vpop.f32.mrb[92].mxu0 }
 0x80d   :  { %v5276_v50 = vpop.eup %5275  ;;  %5285 = vrcp.f32 %v3673_v55  ;;  %v4529_v11 = vpop.f32.mrb[93].mxu0 }
 0x80e   :  { %3712 = vst [vmem:[%s6905_s15 + $0x10] sm:$0xff] %v5276_v50  ;;  %5287 = vpow2.f32 %v4143_v58  ;;  %v4144_v41 = vmul.f32 -1.442695, %v3621_v13  ;;  %v4530_v15 = vadd.f32 %v4529_v11, %v4528_v44  ;;  %v4531_v12 = vpop.f32.mrb[94].mxu0 }
 0x80f   :  { %v5278_v22 = vpop.eup %5277  ;;  %v4532_v40 = vpop.f32.mrb[95].mxu0 }
 0x810   :  { %v5280_v46 = vpop.eup %5279  ;;  %3713 = vst [vmem:[%s6905_s15 + $0x18] sm:$0xff] %v5278_v22  ;;  %5289 = vpow2.f32 %v4144_v41  ;;  %v3601_v26 = vadd.f32 %v4530_v15, %v6809_v53  ;;  %v4533_v48 = vadd.f32 %v4532_v40, %v4531_v12 }
 0x811   :  { %v3674_v38 = vadd.f32 1.0, %v5280_v46 }
 0x812   :  { %v5282_v18 = vpop.eup %5281  ;;  %v3622_v34 = vadd.f32 %v6820_v47, %v3601_v26  ;;  %v3602_v3 = vadd.f32 %v4533_v48, %v6811_v20 }
 0x813   :  { %5291 = vrcp.f32 %v3674_v38  ;;  %v3675_v52 = vadd.f32 1.0, %v5282_v18 }
 0x814   :  { %v4145_v10 = vmul.f32 -1.442695, %v3622_v34  ;;  %v3623_v6 = vadd.f32 %v6820_v47, %v3602_v3  ;;  %v4534_v23 = vpop.f32.mrb[96].mxu0 }
 0x815   :  { %v5284_v30 = vpop.eup %5283  ;;  %5293 = vrcp.f32 %v3675_v52  ;;  %v4535_v24 = vpop.f32.mrb[97].mxu0 }
 0x816   :  { %3714 = vst [vmem:[%s6905_s15 + $0x20] sm:$0xff] %v5284_v30  ;;  %5295 = vpow2.f32 %v4145_v10  ;;  %v4146_v53 = vmul.f32 -1.442695, %v3623_v6  ;;  %v4536_v43 = vadd.f32 %v4535_v24, %v4534_v23  ;;  %v4537_v21 = vpop.f32.mrb[98].mxu0 }
 0x817   :  { %v5286_v1 = vpop.eup %5285  ;;  %v4538_v17 = vpop.f32.mrb[99].mxu0 }
 0x818   :  { %v5288_v20 = vpop.eup %5287  ;;  %3715 = vst [vmem:[%s6905_s15 + $0x28] sm:$0xff] %v5286_v1  ;;  %5297 = vpow2.f32 %v4146_v53  ;;  %v3603_v59 = vadd.f32 %v4536_v43, %v6813_v28  ;;  %v4539_v45 = vadd.f32 %v4538_v17, %v4537_v21 }
 0x819   :  { %v3676_v27 = vadd.f32 1.0, %v5288_v20 }
 0x81a   :  { %v5290_v57 = vpop.eup %5289  ;;  %v3624_v31 = vadd.f32 %v6820_v47, %v3603_v59  ;;  %v3604_v29 = vadd.f32 %v4539_v45, %v6815_v8 }
 0x81b   :  { %5299 = vrcp.f32 %v3676_v27  ;;  %v3677_v16 = vadd.f32 1.0, %v5290_v57 }
 0x81c   :  { %v4147_v32 = vmul.f32 -1.442695, %v3624_v31  ;;  %v3625_v61 = vadd.f32 %v6820_v47, %v3604_v29 }
 0x81d   :  { %v5292_v7 = vpop.eup %5291  ;;  %5301 = vrcp.f32 %v3677_v16 }
 0x81e   :  { %3716 = vst [vmem:[%s6905_s15 + $0x30] sm:$0xff] %v5292_v7  ;;  %5303 = vpow2.f32 %v4147_v32  ;;  %v4148_v28 = vmul.f32 -1.442695, %v3625_v61 }
 0x81f   :  { %v5294_v33 = vpop.eup %5293 }
 0x820   :  { %v5296_v14 = vpop.eup %5295  ;;  %3717 = vst [vmem:[%s6905_s15 + $0x38] sm:$0xff] %v5294_v33  ;;  %5305 = vpow2.f32 %v4148_v28 }
 0x821   :  { %v3678_v8 = vadd.f32 1.0, %v5296_v14 }
 0x822   :  { %v5298_v37 = vpop.eup %5297 }
 0x823   :  { %5307 = vrcp.f32 %v3678_v8  ;;  %v3679_v19 = vadd.f32 1.0, %v5298_v37 }
 0x825   :  { %v5300_v47 = vpop.eup %5299  ;;  %5309 = vrcp.f32 %v3679_v19 }
 0x826   :  { %3718 = vst [vmem:[%s6905_s15 + $0x40] sm:$0xff] %v5300_v47 }
 0x827   :  { %v5302_v4 = vpop.eup %5301 }
 0x828   :  { %v5304_v54 = vpop.eup %5303  ;;  %3719 = vst [vmem:[%s6905_s15 + $0x48] sm:$0xff] %v5302_v4 }
 0x829   :  { %v3680_v62 = vadd.f32 1.0, %v5304_v54 }
 0x82a   :  { %v5306_v39 = vpop.eup %5305 }
 0x82b   :  { %5311 = vrcp.f32 %v3680_v62  ;;  %v3681_v60 = vadd.f32 1.0, %v5306_v39 }
 0x82d   :  { %v5308_v51 = vpop.eup %5307  ;;  %5313 = vrcp.f32 %v3681_v60 }
 0x82e   :  { %3720 = vst [vmem:[%s6905_s15 + $0x50] sm:$0xff] %v5308_v51 }
 0x82f   :  { %v5310_v25 = vpop.eup %5309 }
 0x830   :  { %3721 = vst [vmem:[%s6905_s15 + $0x58] sm:$0xff] %v5310_v25 }
 0x835   :  { %v5312_v36 = vpop.eup %5311 }
 0x836   :  { %3722 = vst [vmem:[%s6905_s15 + $0x60] sm:$0xff] %v5312_v36 }
 0x837   :  { %v5314_v2 = vpop.eup %5313 }
 0x838   :  { %3723 = vst [vmem:[%s6905_s15 + $0x68] sm:$0xff] %v5314_v2 }

</bundles_post_ra>
